<compile_context>
chip_gen: v6e
topology: v6e:2x2x1
jax: 0.10.0
libtpu: 0.0.40
codegen_flags: <defaults>
</compile_context>

<pallas_src>
import functools

import jax
import jax.numpy as jnp
from jax import lax
from jax.experimental import pallas as pl
from jax.experimental.pallas import tpu as pltpu

NUM_CLASSES = 102
_VMEM_LIMIT = 40 * 1024 * 1024  # < 64 MiB physical on v7x, gives headroom on all gens


def _round_up(x, m):
    return ((x + m - 1) // m) * m


# ---------------------------------------------------------------------------
# Fused 3x3 conv (stride 1, pad 1) + bias + ReLU
# ---------------------------------------------------------------------------
def _conv3x3_kernel(x_ref, w_ref, b_ref, o_ref, *, W, Cout, THW):
    # x_ref: (THW, 3*Cin) bf16 -- rows enumerate (h, w) of a TH-row strip,
    #        channels hold the three dy-shifted input rows concatenated.
    # w_ref: (3*Cin, 3*Cout) bf16 -- rows (dy, ci), cols (dx, co).
    t = jnp.dot(x_ref[...], w_ref[...], preferred_element_type=jnp.float32)
    tl = t[:, 0 * Cout:1 * Cout]          # dx=0 taps, evaluated at column w
    tc = t[:, 1 * Cout:2 * Cout]          # dx=1 taps
    tr = t[:, 2 * Cout:3 * Cout]          # dx=2 taps
    # y[j] = tc[j] + tl[j-1] (if w>0) + tr[j+1] (if w<W-1); blocks are whole
    # image rows, so block-boundary taps are exactly the zero padding (masked).
    tl_s = jnp.concatenate([tl[:1], tl[:-1]], axis=0)   # row 0 is filler, masked
    tr_s = jnp.concatenate([tr[1:], tr[-1:]], axis=0)   # last row filler, masked
    col = lax.broadcasted_iota(jnp.int32, (THW, 1), 0) % W
    acc = tc
    acc = acc + jnp.where(col > 0, tl_s, 0.0)
    acc = acc + jnp.where(col < W - 1, tr_s, 0.0)
    acc = jnp.maximum(acc + b_ref[...], 0.0)
    o_ref[...] = acc.astype(o_ref.dtype)


def conv3x3_relu(x, w_hwio, b):
    """x: (N, H, W, Cin) bf16; w_hwio: (3, 3, Cin, Cout) f32; b: (Cout,) f32."""
    N, H, W, Cin = x.shape
    Cout = w_hwio.shape[-1]
    if H >= 224:
        TH = 16
    elif H >= 56:
        TH = 28
    elif H >= 28:
        TH = 14
    else:
        TH = H
    assert H % TH == 0
    THW = TH * W

    # Pad H by 1 and concatenate the three dy-shifted row views along channels.
    # This is the only im2col-style materialization: 3x the activation, in bf16.
    xp = jnp.pad(x, ((0, 0), (1, 1), (0, 0), (0, 0)))
    xcat = jnp.concatenate([xp[:, d:d + H] for d in range(3)], axis=-1)
    xflat = xcat.reshape(N, H * W, 3 * Cin).astype(jnp.bfloat16)

    wmat = jnp.transpose(w_hwio, (0, 2, 1, 3)).reshape(3 * Cin, 3 * Cout)
    wmat = wmat.astype(jnp.bfloat16)
    b2 = b.reshape(1, Cout).astype(jnp.float32)

    kernel = functools.partial(_conv3x3_kernel, W=W, Cout=Cout, THW=THW)
    out = pl.pallas_call(
        kernel,
        out_shape=jax.ShapeDtypeStruct((N, H * W, Cout), jnp.bfloat16),
        grid=(N, H // TH),
        in_specs=[
            pl.BlockSpec((None, THW, 3 * Cin), lambda n, i: (n, i, 0)),
            pl.BlockSpec((3 * Cin, 3 * Cout), lambda n, i: (0, 0)),
            pl.BlockSpec((1, Cout), lambda n, i: (0, 0)),
        ],
        out_specs=pl.BlockSpec((None, THW, Cout), lambda n, i: (n, i, 0)),
        compiler_params=pltpu.CompilerParams(
            dimension_semantics=("parallel", "parallel"),
            vmem_limit_bytes=_VMEM_LIMIT,
        ),
    )(xflat, wmat, b2)
    return out.reshape(N, H, W, Cout)


# ---------------------------------------------------------------------------
# Tiled matmul with fused bias add and optional ReLU (bf16 MXU, f32 accumulate)
# ---------------------------------------------------------------------------
def _mm_bias_kernel(x_ref, w_ref, b_ref, o_ref, acc_ref, *, relu):
    k = pl.program_id(2)

    @pl.when(k == 0)
    def _():
        acc_ref[...] = jnp.zeros_like(acc_ref)

    acc_ref[...] += jnp.dot(x_ref[...], w_ref[...],
                            preferred_element_type=jnp.float32)

    @pl.when(k == pl.num_programs(2) - 1)
    def _():
        r = acc_ref[...] + b_ref[...]
        if relu:
            r = jnp.maximum(r, 0.0)
        o_ref[...] = r.astype(o_ref.dtype)


def matmul_bias(x, w, b, *, relu, tm, tn, tk, out_dtype=jnp.bfloat16):
    """out = relu?(x @ w + b).  x: (M, K), w: (K, N), b: (N,)."""
    M, K = x.shape
    K2, N = w.shape
    assert K == K2
    Mp, Kp, Np = _round_up(M, tm), _round_up(K, tk), _round_up(N, tn)

    xp = x.astype(jnp.bfloat16)
    if (Mp, Kp) != (M, K):
        xp = jnp.pad(xp, ((0, Mp - M), (0, Kp - K)))
    wp = w.astype(jnp.bfloat16)
    if (Kp, Np) != (K, N):
        wp = jnp.pad(wp, ((0, Kp - K), (0, Np - N)))
    bp = b.astype(jnp.float32)
    if Np != N:
        bp = jnp.pad(bp, (0, Np - N))
    bp = bp.reshape(1, Np)

    out = pl.pallas_call(
        functools.partial(_mm_bias_kernel, relu=relu),
        out_shape=jax.ShapeDtypeStruct((Mp, Np), out_dtype),
        grid=(Mp // tm, Np // tn, Kp // tk),
        in_specs=[
            pl.BlockSpec((tm, tk), lambda i, j, k: (i, k)),
            pl.BlockSpec((tk, tn), lambda i, j, k: (k, j)),
            pl.BlockSpec((1, tn), lambda i, j, k: (0, j)),
        ],
        out_specs=pl.BlockSpec((tm, tn), lambda i, j, k: (i, j)),
        scratch_shapes=[pltpu.VMEM((tm, tn), jnp.float32)],
        compiler_params=pltpu.CompilerParams(
            dimension_semantics=("parallel", "parallel", "arbitrary"),
            vmem_limit_bytes=_VMEM_LIMIT,
        ),
    )(xp, wp, bp)
    if (Mp, Np) != (M, N):
        out = out[:M, :N]
    return out


# ---------------------------------------------------------------------------
# 2x2 max pool (elementwise max of the four shifted sub-grids, lane-dense)
# ---------------------------------------------------------------------------
def _max4_kernel(a_ref, b_ref, c_ref, d_ref, o_ref):
    o_ref[...] = jnp.maximum(jnp.maximum(a_ref[...], b_ref[...]),
                             jnp.maximum(c_ref[...], d_ref[...]))


def maxpool2x2(x):
    """x: (N, H, W, C) -> (N, H//2, W//2, C), kernel 2, stride 2."""
    N, H, W, C = x.shape
    H2, W2 = H // 2, W // 2
    subs = (x[:, 0::2, 0::2, :], x[:, 0::2, 1::2, :],
            x[:, 1::2, 0::2, :], x[:, 1::2, 1::2, :])
    L = N * H2 * W2 * C
    lane = 512
    while lane > 128 and L % lane:
        lane //= 2
    assert L % lane == 0
    rows = L // lane
    tr = rows
    for steps in range(1, rows + 1):
        if rows % steps == 0:
            cand = rows // steps
            if cand <= 1024 and (cand % 8 == 0 or cand == rows):
                tr = cand
                break
    flats = [s.reshape(rows, lane) for s in subs]
    out = pl.pallas_call(
        _max4_kernel,
        out_shape=jax.ShapeDtypeStruct((rows, lane), x.dtype),
        grid=(rows // tr,),
        in_specs=[pl.BlockSpec((tr, lane), lambda i: (i, 0)) for _ in range(4)],
        out_specs=pl.BlockSpec((tr, lane), lambda i: (i, 0)),
        compiler_params=pltpu.CompilerParams(
            dimension_semantics=("parallel",),
            vmem_limit_bytes=_VMEM_LIMIT,
        ),
    )(*flats)
    return out.reshape(N, H2, W2, C)


# ---------------------------------------------------------------------------
# Parameter construction (deterministic, He-style init)
# ---------------------------------------------------------------------------
_CONV_CFG = [
    # (in, out, pool_after)
    (3, 64, False), (64, 64, True),
    (64, 128, False), (128, 128, True),
    (128, 256, False), (256, 256, False), (256, 256, True),
    (256, 512, False), (512, 512, False), (512, 512, True),
    (512, 512, False), (512, 512, False), (512, 512, True),
]

_FC_CFG = [
    (512 * 7 * 7, 4096, True),   # (in, out, relu)
    (4096, 4096, True),
    (4096, NUM_CLASSES, False),
]

_FC_TILES = [
    dict(tm=8, tn=1024, tk=3584),   # 25088 = 7 * 3584
    dict(tm=8, tn=1024, tk=2048),
    dict(tm=8, tn=128, tk=2048),
]


def init_params(key):
    params = {"conv": [], "fc": []}
    for li, (cin, cout, _) in enumerate(_CONV_CFG):
        kw = jax.random.fold_in(key, 2 * li)
        w = jax.random.normal(kw, (3, 3, cin, cout), jnp.float32) * jnp.sqrt(
            2.0 / (9 * cin))
        b = jnp.zeros((cout,), jnp.float32)
        params["conv"].append((w, b))
    for li, (fin, fout, _) in enumerate(_FC_CFG):
        kw = jax.random.fold_in(key, 1000 + li)
        w = (jax.random.normal(kw, (fin, fout), jnp.float32)
             * jnp.sqrt(2.0 / fin)).astype(jnp.bfloat16)
        b = jnp.zeros((fout,), jnp.float32)
        params["fc"].append((w, b))
    return params


# ---------------------------------------------------------------------------
# Full forward pass
# ---------------------------------------------------------------------------
def vgg_forward(params, x_nchw):
    # PyTorch input is NCHW; transpose once to NHWC bf16 for the conv stack.
    x = jnp.transpose(x_nchw, (0, 2, 3, 1)).astype(jnp.bfloat16)

    for (w, b), (_, _, pool) in zip(params["conv"], _CONV_CFG):
        x = conv3x3_relu(x, w, b)
        if pool:
            x = maxpool2x2(x)

    # Flatten with torch.flatten(x, 1) semantics on NCHW ordering.
    n = x.shape[0]
    x = jnp.transpose(x, (0, 3, 1, 2)).reshape(n, -1)  # (N, 512*7*7)

    # Classifier (Dropout == identity in eval mode).
    for (w, b), (_, _, relu), tiles in zip(params["fc"], _FC_CFG, _FC_TILES):
        out_dtype = jnp.bfloat16 if relu else jnp.float32
        x = matmul_bias(x, w, b, relu=relu, out_dtype=out_dtype, **tiles)
    return x


# ---------------------------------------------------------------------------
# Tiny numerical self-check of the fused conv kernel vs. lax.conv
# ---------------------------------------------------------------------------
def _conv_reference(x, w, b):
    y = lax.conv_general_dilated(
        x.astype(jnp.float32), w.astype(jnp.bfloat16).astype(jnp.float32),
        window_strides=(1, 1), padding="SAME",
        dimension_numbers=("NHWC", "HWIO", "NHWC"))
    return jnp.maximum(y + b, 0.0)


if __name__ == "__main__":
    key = jax.random.PRNGKey(0)

    # Small conv correctness check (same kernel code path, tiny shapes).
    tkey = jax.random.fold_in(key, 777)
    xt = jax.random.normal(tkey, (1, 14, 14, 16), jnp.float32) * 0.5
    wt = jax.random.normal(jax.random.fold_in(tkey, 1), (3, 3, 16, 32),
                           jnp.float32) * 0.2
    bt = jax.random.normal(jax.random.fold_in(tkey, 2), (32,), jnp.float32) * 0.1
    got = conv3x3_relu(xt.astype(jnp.bfloat16), wt, bt).astype(jnp.float32)
    ref = _conv_reference(xt.astype(jnp.bfloat16), wt, bt)
    err = float(jnp.max(jnp.abs(got - ref)))
    assert err < 0.08, f"conv kernel self-check failed, max abs err = {err}"

    # Full forward pass.  The classifier's 512*7*7 input fixes the spatial
    # size at 224x224 (7 * 2^5 for the five max-pools); keep batch = 1.
    params = init_params(key)
    x = jax.random.normal(jax.random.fold_in(key, 12345),
                          (1, 3, 224, 224), jnp.float32)

    fwd = jax.jit(vgg_forward)
    out = jax.block_until_ready(fwd(params, x))

    assert out.shape == (1, NUM_CLASSES), out.shape
    assert bool(jnp.all(jnp.isfinite(out))), "non-finite output"
    print("KERNEL_OK")
</pallas_src>

<mosaic_0001>
module attributes {stable_mosaic.version = 11 : i64} {
  func.func @_conv3x3_kernel(%arg0: i32, %arg1: i32, %arg2: memref<1x196x48xbf16, #tpu.memory_space<vmem>>, %arg3: memref<48x96xbf16, #tpu.memory_space<vmem>>, %arg4: memref<1x32xf32, #tpu.memory_space<vmem>>, %arg5: memref<1x196x32xbf16, #tpu.memory_space<vmem>>) attributes {dimension_semantics = [#tpu.dimension_semantics<parallel>, #tpu.dimension_semantics<parallel>], iteration_bounds = array<i64: 1, 1>, scalar_prefetch = 0 : i64, scratch_operands = 0 : i64, tpu.core_type = #tpu.core_type<tc>, window_params = [{transform_indices = @transform_0, window_bounds = array<i64: 1, 196, 48>}, {pipeline_mode = #tpu.pipeline_mode<synchronous>, transform_indices = @transform_1, window_bounds = array<i64: 48, 96>}, {pipeline_mode = #tpu.pipeline_mode<synchronous>, transform_indices = @transform_2, window_bounds = array<i64: 1, 32>}, {transform_indices = @transform_3, window_bounds = array<i64: 1, 196, 32>}]} {
    %c0 = arith.constant 0 : index
    %c0_0 = arith.constant 0 : index
    %c0_1 = arith.constant 0 : index
    %0 = vector.load %arg2[%c0, %c0_0, %c0_1] : memref<1x196x48xbf16, #tpu.memory_space<vmem>>, vector<1x196x48xbf16>
    %1 = vector.shape_cast %0 : vector<1x196x48xbf16> to vector<196x48xbf16>
    %c0_2 = arith.constant 0 : index
    %c0_3 = arith.constant 0 : index
    %2 = vector.load %arg3[%c0_2, %c0_3] : memref<48x96xbf16, #tpu.memory_space<vmem>>, vector<48x96xbf16>
    %cst = arith.constant dense<0.000000e+00> : vector<196x96xf32>
    %3 = tpu.matmul %1, %2, %cst {dimension_numbers = #tpu.dot_dimension_numbers<[1], [0], [0], [1], [0, 0, 1, 1], [], []>} : vector<196x48xbf16>, vector<48x96xbf16>, vector<196x96xf32> -> vector<196x96xf32>
    %4 = vector.extract_strided_slice %3 {offsets = [0, 0], sizes = [196, 32], strides = [1, 1]} : vector<196x96xf32> to vector<196x32xf32>
    %5 = vector.extract_strided_slice %3 {offsets = [0, 32], sizes = [196, 32], strides = [1, 1]} : vector<196x96xf32> to vector<196x32xf32>
    %6 = vector.extract_strided_slice %3 {offsets = [0, 64], sizes = [196, 32], strides = [1, 1]} : vector<196x96xf32> to vector<196x32xf32>
    %7 = vector.extract_strided_slice %4 {offsets = [0, 0], sizes = [1, 32], strides = [1, 1]} : vector<196x32xf32> to vector<1x32xf32>
    %8 = vector.extract_strided_slice %4 {offsets = [0, 0], sizes = [195, 32], strides = [1, 1]} : vector<196x32xf32> to vector<195x32xf32>
    %9 = tpu.concatenate %7, %8 in 0 : vector<1x32xf32>, vector<195x32xf32> -> vector<196x32xf32>
    %10 = vector.extract_strided_slice %6 {offsets = [1, 0], sizes = [195, 32], strides = [1, 1]} : vector<196x32xf32> to vector<195x32xf32>
    %11 = vector.extract_strided_slice %6 {offsets = [195, 0], sizes = [1, 32], strides = [1, 1]} : vector<196x32xf32> to vector<1x32xf32>
    %12 = tpu.concatenate %10, %11 in 0 : vector<195x32xf32>, vector<1x32xf32> -> vector<196x32xf32>
    %13 = tpu.iota {dimensions = array<i32: 0>} : vector<196x1xi32>
    %c14_i32 = arith.constant 14 : i32
    %c0_i32 = arith.constant 0 : i32
    %14 = arith.cmpi eq, %c14_i32, %c0_i32 : i32
    %c1_i32 = arith.constant 1 : i32
    %15 = arith.select %14, %c1_i32, %c14_i32 : i32
    %16 = vector.broadcast %15 : i32 to vector<196x1xi32>
    %17 = arith.remsi %13, %16 : vector<196x1xi32>
    %c0_i32_4 = arith.constant 0 : i32
    %18 = vector.broadcast %c0_i32_4 : i32 to vector<196x1xi32>
    %19 = arith.cmpi ne, %17, %18 : vector<196x1xi32>
    %c0_i32_5 = arith.constant 0 : i32
    %20 = vector.broadcast %c0_i32_5 : i32 to vector<196x1xi32>
    %21 = arith.cmpi slt, %17, %20 : vector<196x1xi32>
    %c0_i32_6 = arith.constant 0 : i32
    %22 = arith.cmpi slt, %15, %c0_i32_6 : i32
    %23 = vector.broadcast %22 : i1 to vector<196x1xi1>
    %24 = vector.broadcast %23 : vector<196x1xi1> to vector<196x1xi1>
    %25 = arith.xori %21, %24 : vector<196x1xi1>
    %26 = arith.andi %25, %19 : vector<196x1xi1>
    %27 = vector.broadcast %15 : i32 to vector<196x1xi32>
    %28 = arith.addi %17, %27 : vector<196x1xi32>
    %29 = arith.select %26, %28, %17 : vector<196x1xi1>, vector<196x1xi32>
    %c0_i32_7 = arith.constant 0 : i32
    %30 = vector.broadcast %c0_i32_7 : i32 to vector<196x1xi32>
    %31 = arith.cmpi sgt, %29, %30 : vector<196x1xi32>
    %cst_8 = arith.constant 0.000000e+00 : f32
    %32 = vector.shape_cast %31 : vector<196x1xi1> to vector<196x1xi1>
    %33 = vector.broadcast %32 : vector<196x1xi1> to vector<196x32xi1>
    %34 = vector.broadcast %cst_8 : f32 to vector<196x32xf32>
    %35 = arith.select %33, %9, %34 : vector<196x32xi1>, vector<196x32xf32>
    %36 = arith.addf %5, %35 : vector<196x32xf32>
    %c13_i32 = arith.constant 13 : i32
    %37 = vector.broadcast %c13_i32 : i32 to vector<196x1xi32>
    %38 = arith.cmpi slt, %29, %37 : vector<196x1xi32>
    %cst_9 = arith.constant 0.000000e+00 : f32
    %39 = vector.shape_cast %38 : vector<196x1xi1> to vector<196x1xi1>
    %40 = vector.broadcast %39 : vector<196x1xi1> to vector<196x32xi1>
    %41 = vector.broadcast %cst_9 : f32 to vector<196x32xf32>
    %42 = arith.select %40, %12, %41 : vector<196x32xi1>, vector<196x32xf32>
    %43 = arith.addf %36, %42 : vector<196x32xf32>
    %c0_10 = arith.constant 0 : index
    %c0_11 = arith.constant 0 : index
    %44 = vector.load %arg4[%c0_10, %c0_11] : memref<1x32xf32, #tpu.memory_space<vmem>>, vector<1x32xf32>
    %45 = vector.broadcast %44 : vector<1x32xf32> to vector<196x32xf32>
    %46 = arith.addf %43, %45 : vector<196x32xf32>
    %cst_12 = arith.constant 0.000000e+00 : f32
    %47 = vector.broadcast %cst_12 : f32 to vector<196x32xf32>
    %48 = arith.maximumf %46, %47 : vector<196x32xf32>
    %49 = arith.truncf %48 : vector<196x32xf32> to vector<196x32xbf16>
    %c0_13 = arith.constant 0 : index
    %c0_14 = arith.constant 0 : index
    %c0_15 = arith.constant 0 : index
    %50 = vector.load %arg5[%c0_13, %c0_14, %c0_15] : memref<1x196x32xbf16, #tpu.memory_space<vmem>>, vector<1x196x32xbf16>
    %51 = vector.shape_cast %50 : vector<1x196x32xbf16> to vector<196x32xbf16>
    %52 = vector.shape_cast %49 : vector<196x32xbf16> to vector<1x196x32xbf16>
    tpu.vector_store %arg5[%c0_13, %c0_14, %c0_15], %52 {strides = array<i32>} : memref<1x196x32xbf16, #tpu.memory_space<vmem>>, vector<1x196x32xbf16>,
    return
  }
  func.func @transform_0(%arg0: i32, %arg1: i32) -> (i32, i32, i32) {
    %c0_i32 = arith.constant 0 : i32
    %c0_i32_0 = arith.constant 0 : i32
    return %arg0, %arg1, %c0_i32 : i32, i32, i32
  }
  func.func @transform_1(%arg0: i32, %arg1: i32) -> (i32, i32) {
    %c0_i32 = arith.constant 0 : i32
    %c0_i32_0 = arith.constant 0 : i32
    %c0_i32_1 = arith.constant 0 : i32
    return %c0_i32, %c0_i32_0 : i32, i32
  }
  func.func @transform_2(%arg0: i32, %arg1: i32) -> (i32, i32) {
    %c0_i32 = arith.constant 0 : i32
    %c0_i32_0 = arith.constant 0 : i32
    %c0_i32_1 = arith.constant 0 : i32
    return %c0_i32, %c0_i32_0 : i32, i32
  }
  func.func @transform_3(%arg0: i32, %arg1: i32) -> (i32, i32, i32) {
    %c0_i32 = arith.constant 0 : i32
    %c0_i32_0 = arith.constant 0 : i32
    return %arg0, %arg1, %c0_i32 : i32, i32, i32
  }
}

</mosaic_0001>

<bundles_post_ra>
// kernel: tpu_custom_call.1
= control target key start
LH: loop header
LB: loop body
LE: loop exit
PB: predicated region body
PF: predicated region fallthrough
CT: control target
= control target key end

     0   :  { %v1904_v0 = vmov 0.0   ;;  %vm1905_vm0 = vmmov 0   ;;  %vm127_vm1 = vcmask 392192   ;;  %v481_v17 = vlaneseq  ;;  %s1908_s16 = smov 96   ;;  %s3220_s1 = inlined_call_operand.vmem [shape: bf16[48,96], index: 1, kind: input, shape index: {}]   ;;  %s3221_s0 = inlined_call_operand.vmem [shape: bf16[1,196,48], index: 0, kind: input, shape index: {}]   ;;  %s3222_s2 = inlined_call_operand.vmem [shape: f32[1,32], index: 2, kind: input, shape index: {}]   ;;  %s3223_s3 = inlined_call_operand.vmem [shape: bf16[1,196,32], index: 3, kind: output, shape index: {}]  }
   0x1   :  { %1769 = vmatprep.subr.bf16.mxu0 %v1904_v0  ;;  %1827 = vmatprep.subr.bf16.mxu1 %v1904_v0  ;;  %v1888_v1 = vld [vmem:[%s3220_s1 + $0x10] sm:$0xff]   ;;  %v1889_v2 = vld [vmem:[%s3220_s1 + $0x8] sm:$0xff]   ;;  %v1890_v3 = vld [vmem:[%s3220_s1] sm:$0xff]   ;;  %v3228_v27 = vmov 0  }
   0x2   :  { %1775 = vmatprep.mubr.msk.bf16.mxu0 %vm1905_vm0, %v1904_v0  ;;  %1803 = vmatprep.mubr.msk.bf16.mxu1 %vm1905_vm0, %v1904_v0  ;;  %v1891_v4 = vld [vmem:[%s3221_s0] sm:$0xff]   ;;  %v1892_v5 = vld [vmem:[%s3221_s0 + $0x38] sm:$0xff]   ;;  %v1893_v6 = vld [vmem:[%s3221_s0 + $0x8] sm:$0xff]   ;;  %v2003_v18 = vshrl.u32 %v481_v17, 7 }
   0x3   :  { %1770 = vmatpush3.bf16.msra.mxu0 %v1888_v1  ;;  %1830 = vmatpush3.bf16.msra.mxu1 %v1888_v1  ;;  %v1894_v7 = vld [vmem:[%s3221_s0 + $0x40] sm:$0xff]   ;;  %v1895_v8 = vld [vmem:[%s3221_s0 + $0x10] sm:$0xff]   ;;  %v1896_v9 = vld [vmem:[%s3221_s0 + $0x48] sm:$0xff]  }
   0x4   :  { %1771 = vmatprep.subr.bf16.mxu0 %v1904_v0  ;;  %1828 = vmatprep.subr.bf16.mxu1 %v1904_v0  ;;  %v1897_v10 = vld [vmem:[%s3221_s0 + $0x18] sm:$0xff]   ;;  %v1898_v11 = vld [vmem:[%s3221_s0 + $0x50] sm:$0xff]   ;;  %v1899_v12 = vld [vmem:[%s3221_s0 + $0x20] sm:$0xff]   ;;  %v2006_v19 = vmul.u32.u64.low 2454267026, %v2003_v18  ;;  %v2007_v20 = vmul.u32.u64.high 2454267026, %v2003_v18, %v2006_v19  ;;  %v497_v21 = vadd.s32 120, %v2003_v18 }
   0x5   :  { %v1901_v13 = vld [vmem:[%s3221_s0 + $0x58] sm:$0xff]   ;;  %v1900_v14 = vld [vmem:[%s3221_s0 + $0x28] sm:$0xff]   ;;  %v1903_v15 = vld [vmem:[%s3221_s0 + $0x60] ss:$0 sps:$4 sm:$0x33]   ;;  %v2011_v22 = vadd.s32 8, %v2003_v18 }
   0x6   :  { %v1902_v16 = vld [vmem:[%s3221_s0 + $0x30] sm:$0xff]   ;;  %vm513_vm2 = vc.u32 %v2006_v19, 2454267026  ;;  %v2013_v23 = vmul.u32.u64.low 2454267026, %v497_v21  ;;  %v2014_v24 = vmul.u32.u64.high 2454267026, %v497_v21, %v2013_v23  ;;  %v2022_v29 = vadd.s32 112, %v2003_v18 }
   0x7   :  { %1772 = vmatpush3.bf16.msra.mxu0 %v1889_v2  ;;  %1831 = vmatpush3.bf16.msra.mxu1 %v1889_v2  ;;  %v2017_v25 = vmul.u32.u64.low 2454267026, %v2011_v22  ;;  %v2018_v26 = vmul.u32.u64.high 2454267026, %v2011_v22, %v2017_v25  ;;  %v514_v28 = vsel %vm513_vm2, 1, %v3228_v27  ;;  %v2027_v32 = vadd.s32 128, %v2003_v18  ;;  %s1907_s0 = smov 32  }
   0x8   :  { %1773 = vmatprep.subr.bf16.mxu0 %v1904_v0  ;;  %1829 = vmatprep.subr.bf16.mxu1 %v1904_v0  ;;  %vm723_vm3 = vc.u32 %v2013_v23, 2454267026  ;;  %v515_v30 = vadd.s32 %v2007_v20, %v514_v28  ;;  %v2030_v33 = vmul.u32.u64.low 2454267026, %v2022_v29  ;;  %v2031_v34 = vmul.u32.u64.high 2454267026, %v2022_v29, %v2030_v33 }
   0x9   :  { %vm527_vm4 = vc.u32 %v2017_v25, 2454267026  ;;  %v724_v31 = vsel %vm723_vm3, 1, %v3228_v27  ;;  %v2034_v35 = vadd.s32 16, %v2003_v18  ;;  %v2038_v37 = vadd.s32 24, %v2003_v18 }
   0xa   :  { %v528_v36 = vsel %vm527_vm4, 1, %v3228_v27  ;;  %v725_v38 = vadd.s32 %v2014_v24, %v724_v31  ;;  %v516_v39 = vshrl.u32 %v515_v30, 3  ;;  %vm709_vm5 = vc.u32 %v2030_v33, 2454267026 }
   0xb   :  { %1774 = vmatpush3.bf16.msra.mxu0 %v1890_v3  ;;  %1832 = vmatpush3.bf16.msra.mxu1 %v1890_v3  ;;  %v2042_v40 = vmul.u32.u64.low 2454267026, %v2027_v32  ;;  %v2043_v41 = vmul.u32.u64.high 2454267026, %v2027_v32, %v2042_v40  ;;  %v529_v42 = vadd.s32 %v2018_v26, %v528_v36  ;;  %v2051_v45 = vadd.s32 32, %v2003_v18 }
   0xc   :  { %v2047_v43 = vmul.u32.u64.low 2454267026, %v2034_v35  ;;  %v2048_v44 = vmul.u32.u64.high 2454267026, %v2034_v35, %v2047_v43  ;;  %v2054_v46 = vmul.u32.u64.low 2454267026, %v2038_v37  ;;  %v2055_v47 = vmul.u32.u64.high 2454267026, %v2038_v37, %v2054_v46 }
   0xd   :  { %v2058_v48 = vadd.s32 136, %v2003_v18  ;;  %v726_v49 = vshrl.u32 %v725_v38, 3  ;;  %v2061_v50 = vadd.s32 144, %v2003_v18  ;;  %v517_v51 = vmul.u32 14, %v516_v39 }
   0xe   :  { %1776 = vmatmul.mubr.msk.bf16.vlgmr.msra.gmra.mxu0 %vm127_vm1, %v1891_v4  ;;  %1804 = vmatmul.mubr.msk.bf16.vlgmr.msra.gmra.mxu1 %vm127_vm1, %v1892_v5  ;;  %v710_v52 = vsel %vm709_vm5, 1, %v3228_v27  ;;  %v530_v53 = vshrl.u32 %v529_v42, 3  ;;  %vm737_vm6 = vc.u32 %v2042_v40, 2454267026  ;;  %vm541_vm7 = vc.u32 %v2047_v43, 2454267026 }
   0xf   :  { %1779 = vmatprep.mubr.msk.bf16.mxu0 %vm1905_vm0, %v1904_v0  ;;  %1807 = vmatprep.mubr.msk.bf16.mxu1 %vm1905_vm0, %v1904_v0  ;;  %v2065_v54 = vmul.u32.u64.low 2454267026, %v2051_v45  ;;  %v2066_v55 = vmul.u32.u64.high 2454267026, %v2051_v45, %v2065_v54  ;;  %vm555_vm8 = vc.u32 %v2054_v46, 2454267026  ;;  %v727_v58 = vmul.u32 14, %v726_v49 }
  0x10   :  { %v2069_v56 = vmul.u32.u64.low 2454267026, %v2058_v48  ;;  %v2070_v57 = vmul.u32.u64.high 2454267026, %v2058_v48, %v2069_v56  ;;  %v711_v59 = vadd.s32 %v2031_v34, %v710_v52  ;;  %v738_v62 = vsel %vm737_vm6, 1, %v3228_v27 }
  0x11   :  { %v2074_v60 = vmul.u32.u64.low 2454267026, %v2061_v50  ;;  %v2075_v61 = vmul.u32.u64.high 2454267026, %v2061_v50, %v2074_v60  ;;  %v542_v63 = vsel %vm541_vm7, 1, %v3228_v27  ;;  %vm569_vm9 = vc.u32 %v2065_v54, 2454267026 }
  0x12   :  { %v518_v1 = vsub.s32 %v2003_v18, %v517_v51  ;;  %v531_v2 = vmul.u32 14, %v530_v53  ;;  %vm751_vm10 = vc.u32 %v2069_v56, 2454267026  ;;  %v728_v3 = vsub.s32 %v497_v21, %v727_v58 }
  0x13   :  { %v739_v4 = vadd.s32 %v2043_v41, %v738_v62  ;;  %v712_v5 = vshrl.u32 %v711_v59, 3  ;;  %vm765_vm11 = vc.u32 %v2074_v60, 2454267026  ;;  %v2118_v42 = vadd.s32 160, %v2003_v18 }
  0x14   :  { %vm857_vm12 = vcmp.ne.s32.totalorder %v518_v1, 0  ;;  %vm882_vm13 = vcmp.lt.s32.totalorder %v518_v1, 0  ;;  %vm872_vm14 = vcmp.ne.s32.totalorder %v728_v3, 0  ;;  %vm897_vm15 = vcmp.lt.s32.totalorder %v728_v3, 0 }
  0x15   :  { %v932_v24 = vadd.s32 14, %v518_v1  ;;  %vm907_vm2 = vmand %vm882_vm13, %vm857_vm12  ;;  %v947_v25 = vadd.s32 14, %v728_v3  ;;  %vm404_vm12 = vcmask 1046528  }
  0x16   :  { %1780 = vmatmul.mubr.msk.bf16.gmra.mxu0 %vm127_vm1, %v1893_v6  ;;  %1808 = vmatmul.mubr.msk.bf16.gmra.mxu1 %vm127_vm1, %v1894_v7  ;;  %v543_v6 = vadd.s32 %v2048_v44, %v542_v63  ;;  %vm922_vm3 = vmand %vm897_vm15, %vm872_vm14 }
  0x17   :  { %1783 = vmatprep.mubr.msk.bf16.mxu0 %vm1905_vm0, %v1904_v0  ;;  %1811 = vmatprep.mubr.msk.bf16.mxu1 %vm1905_vm0, %v1904_v0  ;;  %v2112_v41 = vsel %vm907_vm2, %v932_v24, %v518_v1  ;;  %v2120_v43 = vsel %vm922_vm3, %v947_v25, %v728_v3  ;;  %v2174_v3 = vadd.s32 56, %v2003_v18 }
  0x19   :  { %v2224_v24 = vmul.u32.u64.low 2454267026, %v2174_v3  ;;  %v2225_v25 = vmul.u32.u64.high 2454267026, %v2174_v3, %v2224_v24 }
  0x1e   :  { %1784 = vmatmul.mubr.msk.bf16.gmra.mxu0 %vm127_vm1, %v1895_v8  ;;  %1812 = vmatmul.mubr.msk.bf16.gmra.mxu1 %vm127_vm1, %v1896_v9  ;;  %v570_v8 = vsel %vm569_vm9, 1, %v3228_v27  ;;  %v752_v9 = vsel %vm751_vm10, 1, %v3228_v27 }
  0x1f   :  { %1787 = vmatprep.mubr.msk.bf16.mxu0 %vm1905_vm0, %v1904_v0  ;;  %1815 = vmatprep.mubr.msk.bf16.mxu1 %vm1905_vm0, %v1904_v0  ;;  %v753_v19 = vadd.s32 %v2070_v57, %v752_v9  ;;  %v2139_v56 = vmul.u32.u64.low 2454267026, %v2118_v42  ;;  %v2140_v57 = vmul.u32.u64.high 2454267026, %v2118_v42, %v2139_v56 }
  0x21   :  { %v754_v36 = vshrl.u32 %v753_v19, 3  ;;  %vm793_vm3 = vc.u32 %v2139_v56, 2454267026 }
  0x23   :  { %v755_v49 = vmul.u32 14, %v754_v36 }
  0x25   :  { %v756_v60 = vsub.s32 %v2058_v48, %v755_v49 }
  0x26   :  { %1788 = vmatmul.mubr.msk.bf16.gmra.mxu0 %vm127_vm1, %v1897_v10  ;;  %1816 = vmatmul.mubr.msk.bf16.gmra.mxu1 %vm127_vm1, %v1898_v11  ;;  %v2087_v10 = vadd.s32 40, %v2003_v18  ;;  %v532_v11 = vsub.s32 %v2011_v22, %v531_v2  ;;  %v2099_v22 = vadd.s32 48, %v2003_v18 }
  0x27   :  { %1791 = vmatprep.mubr.msk.bf16.mxu0 %vm1905_vm0, %v1904_v0  ;;  %1819 = vmatprep.mubr.msk.bf16.mxu1 %vm1905_vm0, %v1904_v0 }
  0x28   :  { %v2095_v21 = vmul.u32.u64.low 2454267026, %v2087_v10  ;;  %v2096_v23 = vmul.u32.u64.high 2454267026, %v2087_v10, %v2095_v21  ;;  %v933_v31 = vadd.s32 14, %v532_v11 }
  0x29   :  { %v2109_v39 = vmul.u32.u64.low 2454267026, %v2099_v22  ;;  %v2110_v40 = vmul.u32.u64.high 2454267026, %v2099_v22, %v2109_v39 }
  0x2a   :  { %vm583_vm5 = vc.u32 %v2095_v21, 2454267026 }
  0x2b   :  { %v584_v51 = vsel %vm583_vm5, 1, %v3228_v27 }
  0x2e   :  { %1792 = vmatmul.mubr.msk.bf16.gmra.mxu0 %vm127_vm1, %v1899_v12  ;;  %1820 = vmatmul.mubr.msk.bf16.gmra.mxu1 %vm127_vm1, %v1901_v13  ;;  %v766_v12 = vsel %vm765_vm11, 1, %v3228_v27  ;;  %v740_v13 = vshrl.u32 %v739_v4, 3 }
  0x2f   :  { %1795 = vmatprep.mubr.msk.bf16.mxu0 %vm1905_vm0, %v1904_v0  ;;  %1823 = vmatprep.mubr.msk.bf16.mxu1 %vm1905_vm0, %v1904_v0  ;;  %v767_v20 = vadd.s32 %v2075_v61, %v766_v12 }
  0x30   :  { %v741_v26 = vmul.u32 14, %v740_v13 }
  0x31   :  { %v768_v38 = vshrl.u32 %v767_v20, 3 }
  0x32   :  { %v742_v44 = vsub.s32 %v2027_v32, %v741_v26 }
  0x33   :  { %v769_v54 = vmul.u32 14, %v768_v38  ;;  %v2249_v38 = vadd.s32 64, %v2003_v18 }
  0x34   :  { %vm873_vm9 = vcmp.ne.s32.totalorder %v742_v44, 0  ;;  %vm898_vm11 = vcmp.lt.s32.totalorder %v742_v44, 0 }
  0x35   :  { %v770_v63 = vsub.s32 %v2061_v50, %v769_v54 }
  0x36   :  { %1796 = vmatmul.mubr.msk.bf16.gmra.mxu0 %vm127_vm1, %v1900_v14  ;;  %1824 = vmatmul.mubr.msk.bf16.gmra.mxu1 %vm127_vm1, %v1903_v15  ;;  %v713_v14 = vmul.u32 14, %v712_v5  ;;  %v571_v15 = vadd.s32 %v2066_v55, %v570_v8 }
  0x37   :  { %1799 = vmatprep.mubr.msk.bf16.mxu0 %vm1905_vm0, %v1904_v0  ;;  %v556_v0 = vsel %vm555_vm8, 1, %v3228_v27  ;;  %vm858_vm0 = vcmp.ne.s32.totalorder %v532_v11, 0  ;;  %vm597_vm8 = vc.u32 %v2109_v39, 2454267026  ;;  %v2252_v39 = vadd.s32 168, %v2003_v18 }
  0x38   :  { %v557_v7 = vadd.s32 %v2055_v47, %v556_v0  ;;  %v2104_v28 = vsub.s32 %v2022_v29, %v713_v14  ;;  %v572_v30 = vshrl.u32 %v571_v15, 3  ;;  %v2115_v29 = vadd.s32 152, %v2003_v18 }
  0x39   :  { %v598_v61 = vsel %vm597_vm8, 1, %v3228_v27  ;;  %v950_v14 = vadd.s32 14, %v770_v63 }
  0x3a   :  { %v558_v17 = vshrl.u32 %v557_v7, 3  ;;  %vm871_vm6 = vcmp.ne.s32.totalorder %v2104_v28, 0  ;;  %v573_v46 = vmul.u32 14, %v572_v30  ;;  %vm896_vm7 = vcmp.lt.s32.totalorder %v2104_v28, 0 }
  0x3b   :  { %v2135_v32 = vmul.u32.u64.low 2454267026, %v2115_v29  ;;  %v2136_v55 = vmul.u32.u64.high 2454267026, %v2115_v29, %v2135_v32  ;;  %v946_v58 = vadd.s32 14, %v2104_v28  ;;  %vm2156_vm15 = vmand %vm896_vm7, %vm871_vm6  ;;  %v599_v0 = vadd.s32 %v2110_v40, %v598_v61 }
  0x3c   :  { %v559_v34 = vmul.u32 14, %v558_v17  ;;  %v574_v59 = vsub.s32 %v2051_v45, %v573_v46  ;;  %vm874_vm7 = vcmp.ne.s32.totalorder %v756_v60, 0 }
  0x3d   :  { %vm779_vm2 = vc.u32 %v2135_v32, 2454267026  ;;  %v2203_v12 = vsel %vm2156_vm15, %v946_v58, %v2104_v28  ;;  %vm1207_vm15 = vcmp.lt.s32.totalorder %v2112_v41, 13 }
  0x3e   :  { %1800 = vmatmul.mubr.msk.bf16.gmra.mxu0 %vm127_vm1, %v1902_v16  ;;  %v544_v16 = vshrl.u32 %v543_v6, 3  ;;  %vm883_vm1 = vcmp.lt.s32.totalorder %v532_v11, 0  ;;  %v2132_v53 = vsub.s32 %v2038_v37, %v559_v34  ;;  %v948_v37 = vadd.s32 14, %v742_v44 }
  0x3f   :  { %vm908_vm4 = vmand %vm883_vm1, %vm858_vm0  ;;  %vm861_vm5 = vcmp.ne.s32.totalorder %v574_v59, 0  ;;  %vm886_vm8 = vcmp.lt.s32.totalorder %v574_v59, 0  ;;  %v780_v5 = vsel %vm779_vm2, 1, %v3228_v27  ;;  %v794_v6 = vsel %vm793_vm3, 1, %v3228_v27 }
  0x40   :  { %v545_v33 = vmul.u32 14, %v544_v16  ;;  %v2124_v47 = vsel %vm908_vm4, %v933_v31, %v532_v11  ;;  %vm860_vm0 = vcmp.ne.s32.totalorder %v2132_v53, 0  ;;  %vm885_vm1 = vcmp.lt.s32.totalorder %v2132_v53, 0  ;;  %vm2163_vm4 = vmand %vm898_vm11, %vm873_vm9 }
  0x41   :  { %v935_v2 = vadd.s32 14, %v2132_v53  ;;  %vm997_vm9 = vcmp.gt.s32.totalorder %v2120_v43, 0  ;;  %vm2181_vm11 = vmand %vm885_vm1, %vm860_vm0  ;;  %vm983_vm10 = vcmp.gt.s32.totalorder %v2124_v47, 0  ;;  %v2192_v7 = vsel %vm2163_vm4, %v948_v37, %v742_v44 }
  0x42   :  { %v2129_v52 = vsub.s32 %v2034_v35, %v545_v33  ;;  %v585_v35 = vadd.s32 %v2096_v23, %v584_v51  ;;  %vm2196_vm0 = vmand %vm886_vm8, %vm861_vm5  ;;  %v936_v9 = vadd.s32 14, %v574_v59  ;;  %v949_v11 = vadd.s32 14, %v756_v60 }
  0x43   :  { %vm3247_vm1 = vcmp.lt.s32.totalorder %v756_v60, 0  ;;  %v600_v16 = vshrl.u32 %v599_v0, 3  ;;  %v781_v21 = vadd.s32 %v2136_v55, %v780_v5  ;;  %v795_v23 = vadd.s32 %v2140_v57, %v794_v6 }
  0x44   :  { %vm859_vm13 = vcmp.ne.s32.totalorder %v2129_v52, 0  ;;  %vm884_vm14 = vcmp.lt.s32.totalorder %v2129_v52, 0  ;;  %v934_v62 = vadd.s32 14, %v2129_v52  ;;  %v586_v50 = vshrl.u32 %v585_v35, 3  ;;  %vm2207_vm2 = vmand %vm3247_vm1, %vm874_vm7 }
  0x45   :  { %vm2168_vm6 = vmand %vm884_vm14, %vm859_vm13  ;;  %vm875_vm13 = vcmp.ne.s32.totalorder %v770_v63, 0  ;;  %vm900_vm14 = vcmp.lt.s32.totalorder %v770_v63, 0  ;;  %vm998_vm4 = vcmp.gt.s32.totalorder %v2192_v7, 0  ;;  %v2238_v30 = vsel %vm2181_vm11, %v935_v2, %v2132_v53 }
  0x46   :  { %v587_v15 = vmul.u32 14, %v586_v50  ;;  %vm2217_vm3 = vmand %vm900_vm14, %vm875_vm13  ;;  %v2233_v28 = vsel %vm2168_vm6, %v934_v62, %v2129_v52  ;;  %v2242_v34 = vsel %vm2196_vm0, %v936_v9, %v574_v59  ;;  %v2246_v36 = vsel %vm2207_vm2, %v949_v11, %v756_v60 }
  0x47   :  { %vm3253_vm5 = vcmask 1040384   ;;  %v2258_v44 = vsel %vm2217_vm3, %v950_v14, %v770_v63  ;;  %v601_v49 = vmul.u32 14, %v600_v16  ;;  %vm3254_vm8 = vcmp.gt.s32.totalorder %v2112_v41, 0 }
  0x48   :  { %v2261_v46 = vsub.s32 %v2087_v10, %v587_v15  ;;  %v782_v54 = vshrl.u32 %v781_v21, 3  ;;  %v796_v32 = vshrl.u32 %v795_v23, 3  ;;  %vm611_vm6 = vc.u32 %v2224_v24, 2454267026  ;;  %vm3255_vm13 = vmmov %vm3253_vm5 }
  0x49   :  { %vm1221_vm7 = vcmp.lt.s32.totalorder %v2203_v12, 13  ;;  %vm1208_vm11 = vcmp.lt.s32.totalorder %v2124_v47, 13  ;;  %v2277_v35 = vmul.u32.u64.low 2454267026, %v2249_v38  ;;  %v2278_v37 = vmul.u32.u64.high 2454267026, %v2249_v38, %v2277_v35  ;;  %vm3256_vm14 = vmmov %vm3253_vm5 }
  0x4a   :  { %v2281_v60 = vmul.u32.u64.low 2454267026, %v2252_v39  ;;  %v2282_v61 = vmul.u32.u64.high 2454267026, %v2252_v39, %v2281_v60  ;;  %v2292_v48 = vsub.s32 %v2099_v22, %v601_v49  ;;  %vm862_vm0 = vcmp.ne.s32.totalorder %v2261_v46, 0  ;;  %vm3257_vm3 = vmmov %vm3253_vm5 }
  0x4b   :  { %vm887_vm1 = vcmp.lt.s32.totalorder %v2261_v46, 0  ;;  %v612_v4 = vsel %vm611_vm6, 1, %v3228_v27  ;;  %v2307_v22 = vadd.s32 176, %v2003_v18  ;;  %v2318_v14 = vadd.s32 14, %v2261_v46 }
  0x4c   :  { %v783_v15 = vmul.u32 14, %v782_v54  ;;  %v797_v16 = vmul.u32 14, %v796_v32  ;;  %vm625_vm2 = vc.u32 %v2277_v35, 2454267026  ;;  %v613_v23 = vadd.s32 %v2225_v25, %v612_v4 }
  0x4d   :  { %vm888_vm6 = vcmp.lt.s32.totalorder %v2292_v48, 0  ;;  %v938_v4 = vadd.s32 14, %v2292_v48 }
  0xce   :  { %v2211_v17 = vpop.f32.mrf.mxu0  ;;  %v2213_v19 = vpop.f32.mrf.mxu1 }
  0xcf   :  { %3250 = vst [vmem:[#allocation2_spill] sm:$0xff] %v2213_v19  ;;  %v329_v26 = vrot.slane %v2211_v17, 7  ;;  %v3225_v55 = vrot.slane %v2213_v19, 7  ;;  %v405_v62 = vrot.slane %v2211_v17, 1  ;;  %v3224_v20 = vrot.slane %v2213_v19, 1 }
  0xd0   :  { %v1777_v31 = vpop.f32.mrf.mxu0  ;;  %v1805_v33 = vpop.f32.mrf.mxu1 }
  0xd1   :  { %v403_v40 = vsel %vm3253_vm5, %v2211_v17, %v329_v26  ;;  %vm807_vm5 = vc.u32 %v2281_v60, 2454267026 }
  0xd2   :  { %v2263_v51 = vpop.f32.mrf.mxu0  ;;  %v2265_v52 = vpop.f32.mrf.mxu1  ;;  %v1057_v53 = vsel %vm3254_vm8, %v403_v40, 0.0  ;;  %v2334_v40 = vmul.u32.u64.low 2454267026, %v2307_v22  ;;  %v2335_v49 = vmul.u32.u64.high 2454267026, %v2307_v22, %v2334_v40  ;;  %vm863_vm8 = vcmp.ne.s32.totalorder %v2292_v48, 0 }
  0xd3   :  { %v330_v56 = vrot.slane %v2263_v51, 7  ;;  %v406_v57 = vrot.slane %v2263_v51, 1  ;;  %v358_v10 = vrot.slane %v2265_v52, 7  ;;  %1107 = vrot.lane.b32.xlu0 %v1057_v53, %s1907_s0  ;;  %v434_v5 = vrot.slane %v2265_v52, 1 }
  0xd4   :  { %v1778_v58 = vpop.f32.mrf.mxu0  ;;  %v1806_v59 = vpop.f32.mrf.mxu1 }
  0xd5   :  { %v359_v63 = vsel %vm3255_vm13, %v3225_v55, %v358_v10  ;;  %v331_v45 = vsel %vm3256_vm14, %v329_v26, %v330_v56  ;;  %v407_v9 = vsel %vm404_vm12, %v405_v62, %v406_v57  ;;  %v435_v41 = vsel %vm404_vm12, %v3224_v20, %v434_v5 }
  0xd6   :  { %v2294_v50 = vpop.f32.mrf.mxu0  ;;  %v2296_v0 = vpop.f32.mrf.mxu1  ;;  %v1072_v1 = vsel %vm997_vm9, %v359_v63, 0.0  ;;  %v1058_v2 = vsel %vm983_vm10, %v331_v45, 0.0  ;;  %vm1222_vm10 = vcmp.lt.s32.totalorder %v2120_v43, 13  ;;  %vm984_vm9 = vcmp.gt.s32.totalorder %v2233_v28, 0 }
  0xd7   :  { %v408_v6 = vrot.slane %v2294_v50, 1  ;;  %v360_v8 = vrot.slane %v2296_v0, 7  ;;  %1137 = vrot.lane.b32.xlu1 %v1072_v1, %s1907_s0  ;;  %1109 = vrot.lane.b32.xlu0 %v1058_v2, %s1907_s0  ;;  %v1282_v31 = vsel %vm1207_vm15, %v407_v9, 0.0  ;;  %v332_v53 = vrot.slane %v2294_v50, 7 }
  0xd8   :  { %v1781_v11 = vpop.f32.mrf.mxu0  ;;  %v1809_v13 = vpop.f32.mrf.mxu1  ;;  %v436_v54 = vrot.slane %v2296_v0, 1  ;;  %vm985_vm15 = vcmp.gt.s32.totalorder %v2238_v30, 0  ;;  %v2352_v58 = vsub.s32 %v2115_v29, %v783_v15  ;;  %v2355_v59 = vsub.s32 %v2118_v42, %v797_v16 }
  0xd9   :  { %v361_v21 = vsel %vm3257_vm3, %v358_v10, %v360_v8  ;;  %v409_v25 = vsel %vm404_vm12, %v406_v57, %v408_v6  ;;  %v614_v62 = vshrl.u32 %v613_v23, 3  ;;  %v626_v57 = vsel %vm625_vm2, 1, %v3228_v27 }
  0xda   :  { %v2325_v24 = vpop.f32.mrf.mxu0  ;;  %v2327_v26 = vpop.f32.mrf.mxu1  ;;  %v1073_v33 = vsel %vm998_vm4, %v361_v21, 0.0  ;;  %vm986_vm4 = vcmp.gt.s32.totalorder %v2242_v34, 0  ;;  %v808_v63 = vsel %vm807_vm5, 1, %v3228_v27  ;;  %v2362_v45 = vadd.s32 72, %v2003_v18  ;;  %vm2393_vm5 = vmand %vm887_vm1, %vm862_vm0 }
  0xdb   :  { %1332 = vrot.lane.b32.xlu1 %v1282_v31, %s1908_s16  ;;  %1139 = vrot.lane.b32.xlu0 %v1073_v33, %s1907_s0  ;;  %v1296_v29 = vsel %vm1221_vm7, %v435_v41, 0.0  ;;  %v1283_v42 = vsel %vm1208_vm11, %v409_v25, 0.0  ;;  %vm821_vm13 = vc.u32 %v2334_v40, 2454267026  ;;  %v334_v35 = vrot.slane %v2325_v24, 7  ;;  %vm3258_vm7 = vmmov %vm3257_vm3 }
  0xdc   :  { %v1782_v32 = vpop.f32.mrf.mxu0  ;;  %v1810_v10 = vpop.f32.mrf.mxu1  ;;  %v437_v9 = vsel %vm404_vm12, %v434_v5, %v436_v54  ;;  %v333_v47 = vsel %vm3258_vm7, %v330_v56, %v332_v53  ;;  %vm999_vm11 = vcmp.gt.s32.totalorder %v2246_v36, 0  ;;  %vm1000_vm14 = vcmp.gt.s32.totalorder %v2258_v44, 0  ;;  %vm2414_vm0 = vmand %vm888_vm6, %vm863_vm8 }
  0xdd   :  { %vm876_vm2 = vcmp.ne.s32.totalorder %v2352_v58, 0  ;;  %vm901_vm3 = vcmp.lt.s32.totalorder %v2352_v58, 0  ;;  %v627_v15 = vadd.s32 %v2278_v37, %v626_v57  ;;  %v809_v16 = vadd.s32 %v2282_v61, %v808_v63 }
  0xde   :  { %v2364_v1 = vpop.f32.mrf.mxu0  ;;  %v2366_v2 = vpop.f32.mrf.mxu1  ;;  %vm877_vm7 = vcmp.ne.s32.totalorder %v2355_v59, 0  ;;  %v615_v5 = vmul.u32 14, %v614_v62  ;;  %v2399_v21 = vmul.u32.u64.low 2454267026, %v2362_v45  ;;  %v2400_v23 = vmul.u32.u64.high 2454267026, %v2362_v45, %v2399_v21 }
  0xdf   :  { %v336_v60 = vrot.slane %v2364_v1, 7  ;;  %1360 = vrot.lane.b32.xlu1 %v1296_v29, %s1908_s16  ;;  %1334 = vrot.lane.b32.xlu0 %v1283_v42, %s1908_s16  ;;  %v1297_v61 = vsel %vm1222_vm10, %v437_v9, 0.0  ;;  %v1059_v33 = vsel %vm984_vm9, %v333_v47, 0.0  ;;  %vm902_vm1 = vcmp.lt.s32.totalorder %v2355_v59, 0 }
  0xe0   :  { %v1785_v11 = vpop.f32.mrf.mxu0  ;;  %v1813_v13 = vpop.f32.mrf.mxu1  ;;  %v822_v25 = vsel %vm821_vm13, 1, %v3228_v27  ;;  %v362_v32 = vrot.slane %v2327_v26, 7  ;;  %v364_v43 = vrot.slane %v2366_v2, 7  ;;  %vm3263_vm10 = vcmask 1040384   ;;  %vm2435_vm13 = vmand %vm901_vm3, %vm876_vm2 }
  0xe1   :  { %v335_v10 = vsel %vm3263_vm10, %v332_v53, %v334_v35  ;;  %vm3264_vm9 = vmmov %vm3263_vm10  ;;  %vm1209_vm8 = vcmp.lt.s32.totalorder %v2233_v28, 13  ;;  %vm1210_vm6 = vcmp.lt.s32.totalorder %v2238_v30, 13  ;;  %v951_v53 = vadd.s32 14, %v2352_v58 }
  0xe2   :  { %v2402_v31 = vpop.f32.mrf.mxu0  ;;  %v2404_v37 = vpop.f32.mrf.mxu1  ;;  %v337_v62 = vsel %vm3264_vm9, %v334_v35, %v336_v60  ;;  %v952_v29 = vadd.s32 14, %v2355_v59  ;;  %v628_v42 = vshrl.u32 %v627_v15, 3  ;;  %v810_v35 = vshrl.u32 %v809_v16, 3  ;;  %vm2456_vm2 = vmand %vm902_vm1, %vm877_vm7 }
  0xe3   :  { %1362 = vrot.lane.b32.xlu0 %v1297_v61, %s1908_s16  ;;  %1111 = vrot.lane.b32.xlu1 %v1059_v33, %s1907_s0  ;;  %v2445_v9 = vsel %vm2393_vm5, %v2318_v14, %v2261_v46  ;;  %v2450_v47 = vsel %vm2414_vm0, %v938_v4, %v2292_v48  ;;  %v2461_v13 = vsub.s32 %v2174_v3, %v615_v5  ;;  %v1060_v48 = vsel %vm985_vm15, %v335_v10, 0.0  ;;  %vm3269_vm5 = vmmov %vm3264_vm9 }
  0xe4   :  { %v1786_v40 = vpop.f32.mrf.mxu0  ;;  %v1814_v57 = vpop.f32.mrf.mxu1  ;;  %v823_v15 = vadd.s32 %v2335_v49, %v822_v25  ;;  %v1061_v4 = vsel %vm986_vm4, %v337_v62, 0.0  ;;  %vm639_vm3 = vc.u32 %v2399_v21, 2454267026  ;;  %v2473_v16 = vadd.s32 80, %v2003_v18  ;;  %vm3270_vm15 = vmmov %vm3269_vm5 }
  0xe5   :  { %v410_v56 = vrot.slane %v2325_v24, 1  ;;  %v412_v3 = vrot.slane %v2364_v1, 1  ;;  %v363_v49 = vsel %vm3269_vm5, %v360_v8, %v362_v32  ;;  %v365_v5 = vsel %vm3270_vm15, %v362_v32, %v364_v43 }
  0xe6   :  { %v2464_v46 = vpop.f32.mrf.mxu0  ;;  %v2466_v14 = vpop.f32.mrf.mxu1  ;;  %vm1223_vm4 = vcmp.lt.s32.totalorder %v2192_v7, 13  ;;  %vm1224_vm7 = vcmp.lt.s32.totalorder %v2246_v36, 13  ;;  %v2490_v41 = vsel %vm2435_vm13, %v951_v53, %v2352_v58  ;;  %v2495_v25 = vsel %vm2456_vm2, %v952_v29, %v2355_v59 }
  0xe7   :  { %1113 = vrot.lane.b32.xlu1 %v1060_v48, %s1907_s0  ;;  %1115 = vrot.lane.b32.xlu0 %v1061_v4, %s1907_s0  ;;  %v629_v8 = vmul.u32 14, %v628_v42  ;;  %v811_v10 = vmul.u32 14, %v810_v35  ;;  %vm864_vm0 = vcmp.ne.s32.totalorder %v2461_v13, 0  ;;  %v824_v32 = vshrl.u32 %v823_v15, 3 }
  0xe8   :  { %v1789_v61 = vpop.f32.mrf.mxu0  ;;  %v1817_v33 = vpop.f32.mrf.mxu1  ;;  %v640_v62 = vsel %vm639_vm3, 1, %v3228_v27  ;;  %v2501_v40 = vadd.s32 184, %v2003_v18  ;;  %v1074_v58 = vsel %vm999_vm11, %v363_v49, 0.0  ;;  %v1075_v59 = vsel %vm1000_vm14, %v365_v5, 0.0 }
  0xe9   :  { %v2512_v53 = vmul.u32.u64.low 2454267026, %v2473_v16  ;;  %v2513_v29 = vmul.u32.u64.high 2454267026, %v2473_v16, %v2512_v53  ;;  %v438_v21 = vrot.slane %v2327_v26, 1  ;;  %v440_v42 = vrot.slane %v2366_v2, 1 }
  0xea   :  { %v2503_v57 = vpop.f32.mrf.mxu0  ;;  %v2509_v63 = vpop.f32.mrf.mxu1  ;;  %v411_v35 = vsel %vm404_vm12, %v408_v6, %v410_v56  ;;  %v413_v11 = vsel %vm404_vm12, %v410_v56, %v412_v3  ;;  %vm987_vm11 = vcmp.gt.s32.totalorder %v2445_v9, 0  ;;  %vm988_vm14 = vcmp.gt.s32.totalorder %v2450_v47, 0 }
  0xeb   :  { %1141 = vrot.lane.b32.xlu1 %v1074_v58, %s1907_s0  ;;  %1143 = vrot.lane.b32.xlu0 %v1075_v59, %s1907_s0  ;;  %vm889_vm1 = vcmp.lt.s32.totalorder %v2461_v13, 0  ;;  %v939_v4 = vadd.s32 14, %v2461_v13  ;;  %v2530_v49 = vsub.s32 %v2249_v38, %v629_v8  ;;  %v2533_v5 = vsub.s32 %v2252_v39, %v811_v10 }
  0xec   :  { %v1790_v15 = vpop.f32.mrf.mxu0  ;;  %v1818_v48 = vpop.f32.mrf.mxu1  ;;  %v825_v6 = vmul.u32 14, %v824_v32  ;;  %v641_v61 = vadd.s32 %v2400_v23, %v640_v62  ;;  %v2537_v56 = vmul.u32.u64.low 2454267026, %v2501_v40  ;;  %v2538_v33 = vmul.u32.u64.high 2454267026, %v2501_v40, %v2537_v56  ;;  %vm2571_vm5 = vmand %vm889_vm1, %vm864_vm0 }
  0xed   :  { %v1284_v59 = vsel %vm1209_vm8, %v411_v35, 0.0  ;;  %v1285_v15 = vsel %vm1210_vm6, %v413_v11, 0.0  ;;  %vm653_vm10 = vc.u32 %v2512_v53, 2454267026  ;;  %v2549_v39 = vadd.s32 192, %v2003_v18 }
  0xee   :  { %v2540_v58 = vpop.f32.mrf.mxu0  ;;  %v2546_v38 = vpop.f32.mrf.mxu1  ;;  %v338_v23 = vrot.slane %v2402_v31, 7  ;;  %v3226_v8 = vrot.slane %v2464_v46, 7  ;;  %v439_v28 = vsel %vm404_vm12, %v436_v54, %v438_v21  ;;  %v441_v30 = vsel %vm404_vm12, %v438_v21, %v440_v42 }
  0xef   :  { %1336 = vrot.lane.b32.xlu1 %v1284_v59, %s1908_s16  ;;  %1338 = vrot.lane.b32.xlu0 %v1285_v15, %s1908_s16  ;;  %vm1001_vm9 = vcmp.gt.s32.totalorder %v2490_v41, 0  ;;  %vm1002_vm8 = vcmp.gt.s32.totalorder %v2495_v25, 0  ;;  %vm865_vm6 = vcmp.ne.s32.totalorder %v2530_v49, 0  ;;  %vm890_vm13 = vcmp.lt.s32.totalorder %v2530_v49, 0 }
  0xf0   :  { %v1793_v10 = vpop.f32.mrf.mxu0  ;;  %v1821_v32 = vpop.f32.mrf.mxu1  ;;  %vm878_vm2 = vcmp.ne.s32.totalorder %v2533_v5, 0  ;;  %vm903_vm3 = vcmp.lt.s32.totalorder %v2533_v5, 0  ;;  %v2576_v62 = vsub.s32 %v2307_v22, %v825_v6  ;;  %v642_v21 = vshrl.u32 %v641_v61, 3 }
  0xf1   :  { %v654_v35 = vsel %vm653_vm10, 1, %v3228_v27  ;;  %vm835_vm15 = vc.u32 %v2537_v56, 2454267026  ;;  %v1298_v48 = vsel %vm1223_vm4, %v439_v28, 0.0  ;;  %v1299_v59 = vsel %vm1224_vm7, %v441_v30, 0.0  ;;  %vm2616_vm10 = vmand %vm890_vm13, %vm865_vm6 }
  0xf2   :  { %v2580_v11 = vpop.f32.mrf.mxu0  ;;  %v2586_v15 = vpop.f32.mrf.mxu1  ;;  %v2589_v10 = vmul.u32.u64.low 2454267026, %v2549_v39  ;;  %v2590_v32 = vmul.u32.u64.high 2454267026, %v2549_v39, %v2589_v10  ;;  %v366_v22 = vrot.slane %v2404_v37, 7  ;;  %v3227_v53 = vrot.slane %v2466_v14, 7  ;;  %vm2636_vm6 = vmand %vm903_vm3, %vm878_vm2 }
  0xf3   :  { %3273 = vst [vmem:[#allocation3_spill] sm:$0xff] %v2586_v15  ;;  %1364 = vrot.lane.b32.xlu1 %v1298_v48, %s1908_s16  ;;  %1366 = vrot.lane.b32.xlu0 %v1299_v59, %s1908_s16  ;;  %vm3274_vm4 = vcmask 1040384   ;;  %vm1211_vm0 = vcmp.lt.s32.totalorder %v2242_v34, 13  ;;  %vm1212_vm1 = vcmp.lt.s32.totalorder %v2445_v9, 13  ;;  %v2607_v28 = vsel %vm2571_vm5, %v939_v4, %v2461_v13 }
  0xf4   :  { %v339_v7 = vsel %vm3274_vm4, %v336_v60, %v338_v23  ;;  %vm3275_vm7 = vmmov %vm3274_vm4  ;;  %v1794_v6 = vpop.f32.mrf.mxu0  ;;  %v1822_v61 = vpop.f32.mrf.mxu1  ;;  %v940_v30 = vadd.s32 14, %v2530_v49  ;;  %v953_v48 = vadd.s32 14, %v2533_v5  ;;  %v655_v60 = vadd.s32 %v2513_v29, %v654_v35 }
  0xf5   :  { %v341_v36 = vsel %vm3275_vm7, %v338_v23, %v3226_v8  ;;  %vm879_vm4 = vcmp.ne.s32.totalorder %v2576_v62, 0  ;;  %vm904_vm7 = vcmp.lt.s32.totalorder %v2576_v62, 0  ;;  %v643_v13 = vmul.u32 14, %v642_v21 }
  0xf6   :  { %v836_v4 = vsel %vm835_vm15, 1, %v3228_v27  ;;  %v2624_v54 = vpop.f32.mrf.mxu0  ;;  %v1062_v29 = vsel %vm987_vm11, %v339_v7, 0.0  ;;  %v1063_v35 = vsel %vm988_vm14, %v341_v36, 0.0  ;;  %v2630_v59 = vpop.f32.mrf.mxu1  ;;  %vm849_vm13 = vc.u32 %v2589_v10, 2454267026  ;;  %vm2671_vm5 = vmand %vm904_vm7, %vm879_vm4 }
  0xf7   :  { %3278 = vst [vmem:[#allocation4_spill] sm:$0xff] %v2630_v59  ;;  %v2641_v56 = vadd.s32 88, %v2003_v18  ;;  %v414_v21 = vrot.slane %v2402_v31, 1  ;;  %v416_v7 = vrot.slane %v2464_v46, 1  ;;  %1117 = vrot.lane.b32.xlu1 %v1062_v29, %s1907_s0  ;;  %1119 = vrot.lane.b32.xlu0 %v1063_v35, %s1907_s0  ;;  %vm3281_vm11 = vcmask 1040384  }
  0xf8   :  { %v367_v36 = vsel %vm3281_vm11, %v364_v43, %v366_v22  ;;  %vm3282_vm14 = vmmov %vm3281_vm11  ;;  %vm1225_vm2 = vcmp.lt.s32.totalorder %v2258_v44, 13  ;;  %vm1226_vm3 = vcmp.lt.s32.totalorder %v2490_v41, 13  ;;  %v1797_v20 = vpop.f32.mrf.mxu0  ;;  %v2658_v55 = vsel %vm2616_vm10, %v940_v30, %v2530_v49  ;;  %v1825_v35 = vpop.f32.mrf.mxu1 }
  0xf9   :  { %v369_v61 = vsel %vm3282_vm14, %v366_v22, %v3227_v53  ;;  %v954_v29 = vadd.s32 14, %v2576_v62  ;;  %v656_v8 = vshrl.u32 %v655_v60, 3  ;;  %v837_v43 = vadd.s32 %v2538_v33, %v836_v4 }
  0xfa   :  { %v2665_v22 = vsel %vm2636_vm6, %v953_v48, %v2533_v5  ;;  %v2676_v49 = vsub.s32 %v2362_v45, %v643_v13  ;;  %v850_v30 = vsel %vm849_vm13, 1, %v3228_v27  ;;  %v2681_v33 = vadd.s32 96, %v2003_v18  ;;  %v2683_v60 = vpop.f32.mrf.mxu0  ;;  %v300_v23 = vpop.f32.mrf.mxu1  ;;  %vm3290_vm13 = vmmov %vm3281_vm11 }
  0xfb   :  { %3285 = vst [vmem:[#allocation5_spill] sm:$0xff] %v2683_v60  ;;  %v1076_v5 = vsel %vm1001_vm9, %v367_v36, 0.0  ;;  %v1077_v48 = vsel %vm1002_vm8, %v369_v61, 0.0  ;;  %v2690_v4 = vmul.u32.u64.low 2454267026, %v2641_v56  ;;  %v2691_v6 = vmul.u32.u64.high 2454267026, %v2641_v56, %v2690_v4 }
  0xfc   :  { %v442_v45 = vrot.slane %v2404_v37, 1  ;;  %v444_v10 = vrot.slane %v2466_v14, 1  ;;  %1145 = vrot.lane.b32.xlu1 %v1076_v5, %s1907_s0  ;;  %1147 = vrot.lane.b32.xlu0 %v1077_v48, %s1907_s0  ;;  %v415_v13 = vsel %vm404_vm12, %v412_v3, %v414_v21  ;;  %v417_v36 = vsel %vm404_vm12, %v414_v21, %v416_v7  ;;  %v1798_v61 = vpop.f32.mrf.mxu0  ;;  %v1826_v23 = vpop.f32.mrf.mxu1 }
  0xfd   :  { %v2706_v35 = vsel %vm2671_vm5, %v954_v29, %v2576_v62  ;;  %v657_v53 = vmul.u32 14, %v656_v8  ;;  %v838_v27 = vshrl.u32 %v837_v43, 3  ;;  %v851_v5 = vadd.s32 %v2590_v32, %v850_v30  ;;  %vm3292_vm5 = vmmov %vm3281_vm11 }
  0xfe   :  { %vm989_vm9 = vcmp.gt.s32.totalorder %v2607_v28, 0  ;;  %vm990_vm8 = vcmp.gt.s32.totalorder %v2658_v55, 0  ;;  %v2712_v3 = vmul.u32.u64.low 2454267026, %v2681_v33  ;;  %v2713_v48 = vmul.u32.u64.high 2454267026, %v2681_v33, %v2712_v3  ;;  %v2716_v61 = vpop.f32.mrf.mxu0 }
  0xff   :  { %v342_v21 = vrot.slane %v2503_v57, 7  ;;  %3286 = vst [vmem:[#allocation6_spill] sm:$0xff] %v2716_v61  ;;  %v1286_v62 = vsel %vm1211_vm0, %v415_v13, 0.0  ;;  %v1287_v8 = vsel %vm1212_vm1, %v417_v36, 0.0  ;;  %vm667_vm15 = vc.u32 %v2690_v4, 2454267026 }
 0x100   :  { %v344_v32 = vrot.slane %v2540_v58, 7  ;;  %1340 = vrot.lane.b32.xlu1 %v1286_v62, %s1908_s16  ;;  %1342 = vrot.lane.b32.xlu0 %v1287_v8, %s1908_s16  ;;  %v443_v29 = vsel %vm404_vm12, %v440_v42, %v442_v45  ;;  %v445_v43 = vsel %vm404_vm12, %v442_v45, %v444_v10  ;;  %vm1003_vm0 = vcmp.gt.s32.totalorder %v2665_v22, 0  ;;  %v1801_v34 = vpop.f32.mrf.mxu0 }
 0x101   :  { %vm1004_vm10 = vcmp.gt.s32.totalorder %v2706_v35, 0  ;;  %vm866_vm1 = vcmp.ne.s32.totalorder %v2676_v49, 0  ;;  %v2735_v9 = vsub.s32 %v2473_v16, %v657_v53  ;;  %v839_v20 = vmul.u32 14, %v838_v27 }
 0x102   :  { %v852_v30 = vshrl.u32 %v851_v5, 3  ;;  %vm891_vm4 = vcmp.lt.s32.totalorder %v2676_v49, 0  ;;  %v3287_v4 = vmov 0   ;;  %vm681_vm7 = vc.u32 %v2712_v3, 2454267026  ;;  %v2741_v13 = vpop.f32.mrf.mxu0 }
 0x103   :  { %v668_v42 = vsel %vm667_vm15, 1, %v3287_v4  ;;  %vm996_vm6 = vcmp.gt.s32.totalorder %v2203_v12, 0  ;;  %v370_v45 = vrot.slane %v2509_v63, 7  ;;  %3288 = vst [vmem:[#allocation7_spill] sm:$0xff] %v2741_v13  ;;  %v1300_v36 = vsel %vm1225_vm2, %v443_v29, 0.0 }
 0x104   :  { %v1301_v16 = vsel %vm1226_vm3, %v445_v43, 0.0  ;;  %v3289_v27 = vrot.slane %v2464_v46, 7  ;;  %v372_v23 = vrot.slane %v2546_v38, 7  ;;  %v354_v5 = vrot.slane %v2741_v13, 7  ;;  %1368 = vrot.lane.b32.xlu1 %v1300_v36, %s1908_s16  ;;  %v1802_v29 = vpop.f32.mrf.mxu0 }
 0x105   :  { %v3230_v62 = vrot.slane %v2741_v13, 1  ;;  %1370 = vrot.lane.b32.xlu0 %v1301_v16, %s1908_s16  ;;  %v345_v44 = vsel %vm3281_vm11, %v342_v21, %v344_v32  ;;  %vm1213_vm14 = vcmp.lt.s32.totalorder %v2450_v47, 13  ;;  %vm867_vm2 = vcmp.ne.s32.totalorder %v2735_v9, 0 }
 0x106   :  { %v343_v53 = vsel %vm3290_vm13, %v3289_v27, %v342_v21  ;;  %vm892_vm3 = vcmp.lt.s32.totalorder %v2735_v9, 0  ;;  %v2762_v41 = vsub.s32 %v2501_v40, %v839_v20  ;;  %v853_v8 = vmul.u32 14, %v852_v30 }
 0x107   :  { %v669_v43 = vadd.s32 %v2691_v6, %v668_v42  ;;  %v682_v34 = vsel %vm681_vm7, 1, %v3287_v4  ;;  %v3291_v36 = vrot.slane %v2213_v19, 7  ;;  %v3293_v16 = vrot.slane %v2213_v19, 1 }
 0x108   :  { %v1064_v20 = vsel %vm989_vm9, %v343_v53, 0.0  ;;  %v1065_v6 = vsel %vm990_vm8, %v345_v44, 0.0  ;;  %v2788_v30 = vadd.s32 104, %v2003_v18  ;;  %v418_v42 = vrot.slane %v2503_v57, 1  ;;  %vm3295_vm9 = vmmov %vm3292_vm5 }
 0x109   :  { %v357_v21 = vsel %vm3292_vm5, %v354_v5, %v3291_v36  ;;  %v2777_v40 = vsel %vm404_vm12, %v3230_v62, %v3293_v16  ;;  %v420_v27 = vrot.slane %v2540_v58, 1  ;;  %1121 = vrot.lane.b32.xlu1 %v1064_v20, %s1907_s0  ;;  %1123 = vrot.lane.b32.xlu0 %v1065_v6, %s1907_s0  ;;  %v3294_v53 = vrot.slane %v2466_v14, 7  ;;  %vm3296_vm8 = vmmov %vm3292_vm5 }
 0x10a   :  { %v2785_v3 = vsel %vm996_vm6, %v357_v21, 0.0  ;;  %v373_v12 = vsel %vm3296_vm8, %v370_v45, %v372_v23  ;;  %vm1227_vm15 = vcmp.lt.s32.totalorder %v2495_v25, 13  ;;  %vm1214_vm7 = vcmp.lt.s32.totalorder %v2607_v28, 13  ;;  %vm2809_vm6 = vmand %vm891_vm4, %vm866_vm1 }
 0x10b   :  { %v371_v29 = vsel %vm3295_vm9, %v3294_v53, %v370_v45  ;;  %v941_v18 = vadd.s32 14, %v2676_v49  ;;  %v854_v44 = vsub.s32 %v2549_v39, %v853_v8  ;;  %v683_v36 = vadd.s32 %v2713_v48, %v682_v34  ;;  %vm917_vm1 = vmand %vm892_vm3, %vm867_vm2 }
 0x10c   :  { %v942_v45 = vadd.s32 14, %v2735_v9  ;;  %vm880_vm13 = vcmp.ne.s32.totalorder %v2762_v41, 0  ;;  %vm905_vm11 = vcmp.lt.s32.totalorder %v2762_v41, 0  ;;  %v670_v16 = vshrl.u32 %v669_v43, 3 }
 0x10d   :  { %v1078_v39 = vsel %vm1003_vm0, %v371_v29, 0.0  ;;  %v1079_v48 = vsel %vm1004_vm10, %v373_v12, 0.0  ;;  %v2825_v8 = vmul.u32.u64.low 2454267026, %v2788_v30  ;;  %v2826_v34 = vmul.u32.u64.high 2454267026, %v2788_v30, %v2825_v8  ;;  %vm2856_vm2 = vmand %vm905_vm11, %vm880_vm13 }
 0x10e   :  { %v446_v20 = vrot.slane %v2509_v63, 1  ;;  %v448_v6 = vrot.slane %v2546_v38, 1  ;;  %1149 = vrot.lane.b32.xlu1 %v1078_v39, %s1907_s0  ;;  %1151 = vrot.lane.b32.xlu0 %v1079_v48, %s1907_s0  ;;  %v419_v43 = vsel %vm404_vm12, %v416_v7, %v418_v42  ;;  %v421_v53 = vsel %vm404_vm12, %v418_v42, %v420_v27 }
 0x10f   :  { %vm1228_vm0 = vcmp.lt.s32.totalorder %v2665_v22, 13  ;;  %vm881_vm10 = vcmp.ne.s32.totalorder %v854_v44, 0  ;;  %vm906_vm4 = vcmp.lt.s32.totalorder %v854_v44, 0  ;;  %v684_v29 = vshrl.u32 %v683_v36, 3 }
 0x110   :  { %v2842_v12 = vsel %vm2809_vm6, %v941_v18, %v2676_v49  ;;  %v2845_v39 = vsel %vm917_vm1, %v942_v45, %v2735_v9  ;;  %v955_v48 = vadd.s32 14, %v2762_v41  ;;  %v671_v7 = vmul.u32 14, %v670_v16  ;;  %vm3302_vm1 = vmmov %vm3296_vm8 }
 0x111   :  { %v1288_v62 = vsel %vm1213_vm14, %v419_v43, 0.0  ;;  %v1289_v42 = vsel %vm1214_vm7, %v421_v53, 0.0  ;;  %v956_v49 = vadd.s32 14, %v854_v44  ;;  %vm695_vm3 = vc.u32 %v2825_v8, 2454267026  ;;  %vm931_vm14 = vmand %vm906_vm4, %vm881_vm10 }
 0x112   :  { %v346_v9 = vrot.slane %v2580_v11, 7  ;;  %v348_v18 = vrot.slane %v2624_v54, 7  ;;  %1344 = vrot.lane.b32.xlu1 %v1288_v62, %s1908_s16  ;;  %1346 = vrot.lane.b32.xlu0 %v1289_v42, %s1908_s16  ;;  %v447_v47 = vsel %vm404_vm12, %v444_v10, %v446_v20  ;;  %v449_v28 = vsel %vm404_vm12, %v446_v20, %v448_v6 }
 0x113   :  { %v685_v21 = vmul.u32 14, %v684_v29  ;;  %vm991_vm5 = vcmp.gt.s32.totalorder %v2842_v12, 0  ;;  %vm992_vm9 = vcmp.gt.s32.totalorder %v2845_v39, 0  ;;  %v672_v62 = vsub.s32 %v2641_v56, %v671_v7 }
 0x114   :  { %v696_v45 = vsel %vm695_vm3, 1, %v3287_v4  ;;  %v1302_v16 = vsel %vm1227_vm15, %v447_v47, 0.0  ;;  %v1303_v10 = vsel %vm1228_vm0, %v449_v28, 0.0  ;;  %v980_v8 = vsel %vm2856_vm2, %v955_v48, %v2762_v41  ;;  %vm3301_vm15 = vmmov %vm3296_vm8 }
 0x115   :  { %v2883_v20 = vsel %vm931_vm14, %v956_v49, %v854_v44  ;;  %v374_v43 = vrot.slane %v2586_v15, 7  ;;  %v376_v53 = vrot.slane %v2630_v59, 7  ;;  %v347_v25 = vsel %vm3296_vm8, %v344_v32, %v346_v9  ;;  %vm3303_vm0 = vmmov %vm3302_vm1 }
 0x116   :  { %1372 = vrot.lane.b32.xlu1 %v1302_v16, %s1908_s16  ;;  %1374 = vrot.lane.b32.xlu0 %v1303_v10, %s1908_s16  ;;  %v349_v56 = vsel %vm3301_vm15, %v346_v9, %v348_v18  ;;  %v686_v22 = vsub.s32 %v2681_v33, %v685_v21  ;;  %v697_v4 = vadd.s32 %v2826_v34, %v696_v45  ;;  %vm1005_vm7 = vcmp.gt.s32.totalorder %v980_v8, 0 }
 0x117   :  { %vm868_vm6 = vcmp.ne.s32.totalorder %v672_v62, 0  ;;  %v1066_v41 = vsel %vm991_vm5, %v347_v25, 0.0  ;;  %v1067_v44 = vsel %vm992_vm9, %v349_v56, 0.0  ;;  %vm1006_vm13 = vcmp.gt.s32.totalorder %v2883_v20, 0 }
 0x118   :  { %vm893_vm11 = vcmp.lt.s32.totalorder %v672_v62, 0  ;;  %v422_v32 = vrot.slane %v2580_v11, 1  ;;  %v424_v29 = vrot.slane %v2624_v54, 1  ;;  %v375_v33 = vsel %vm3302_vm1, %v372_v23, %v374_v43 }
 0x119   :  { %v377_v34 = vsel %vm3303_vm0, %v374_v43, %v376_v53  ;;  %vm869_vm10 = vcmp.ne.s32.totalorder %v686_v22, 0  ;;  %vm894_vm4 = vcmp.lt.s32.totalorder %v686_v22, 0  ;;  %v698_v48 = vshrl.u32 %v697_v4, 3  ;;  %vm918_vm14 = vmand %vm893_vm11, %vm868_vm6 }
 0x11a   :  { %1125 = vrot.lane.b32.xlu1 %v1066_v41, %s1907_s0  ;;  %1127 = vrot.lane.b32.xlu0 %v1067_v44, %s1907_s0  ;;  %vm1215_vm2 = vcmp.lt.s32.totalorder %v2658_v55, 13  ;;  %vm1216_vm3 = vcmp.lt.s32.totalorder %v2842_v12, 13  ;;  %v1080_v7 = vsel %vm1005_vm7, %v375_v33, 0.0  ;;  %v1081_v42 = vsel %vm1006_vm13, %v377_v34, 0.0  ;;  %vm919_vm5 = vmand %vm894_vm4, %vm869_vm10 }
 0x11b   :  { %v943_v36 = vadd.s32 14, %v672_v62  ;;  %v944_v49 = vadd.s32 14, %v686_v22  ;;  %v450_v9 = vrot.slane %v2586_v15, 1  ;;  %v452_v23 = vrot.slane %v2630_v59, 1  ;;  %vm3304_vm6 = vmmov %vm3303_vm0 }
 0x11c   :  { %v423_v47 = vsel %vm404_vm12, %v420_v27, %v422_v32  ;;  %v425_v28 = vsel %vm404_vm12, %v422_v32, %v424_v29  ;;  %v699_v21 = vmul.u32 14, %v698_v48  ;;  %vm1229_vm9 = vcmp.lt.s32.totalorder %v2706_v35, 13  ;;  %vm3305_vm13 = vmmov %vm3303_vm0 }
 0x11d   :  { %vm1230_vm8 = vcmp.lt.s32.totalorder %v980_v8, 13  ;;  %v1290_v45 = vsel %vm1215_vm2, %v423_v47, 0.0  ;;  %v1291_v16 = vsel %vm1216_vm3, %v425_v28, 0.0  ;;  %v968_v10 = vsel %vm918_vm14, %v943_v36, %v672_v62  ;;  %vm3306_vm2 = vmmov %vm3304_vm6 }
 0x11e   :  { %1153 = vrot.lane.b32.xlu1 %v1080_v7, %s1907_s0  ;;  %1155 = vrot.lane.b32.xlu0 %v1081_v42, %s1907_s0  ;;  %v969_v43 = vsel %vm919_vm5, %v944_v49, %v686_v22  ;;  %v350_v53 = vrot.slane %v2683_v60, 7  ;;  %v352_v27 = vrot.slane %v2716_v61, 7  ;;  %v451_v35 = vsel %vm404_vm12, %v448_v6, %v450_v9 }
 0x11f   :  { %v453_v55 = vsel %vm404_vm12, %v450_v9, %v452_v23  ;;  %v700_v8 = vsub.s32 %v2788_v30, %v699_v21  ;;  %v1304_v12 = vsel %vm1229_vm9, %v451_v35, 0.0  ;;  %vm993_vm15 = vcmp.gt.s32.totalorder %v968_v10, 0 }
 0x120   :  { %v1305_v25 = vsel %vm1230_vm8, %v453_v55, 0.0  ;;  %vm994_vm7 = vcmp.gt.s32.totalorder %v969_v43, 0  ;;  %v426_v62 = vrot.slane %v2683_v60, 1  ;;  %v428_v56 = vrot.slane %v2716_v61, 1 }
 0x121   :  { %v351_v6 = vsel %vm3304_vm6, %v348_v18, %v350_v53  ;;  %v353_v22 = vsel %vm3305_vm13, %v350_v53, %v352_v27  ;;  %vm870_vm11 = vcmp.ne.s32.totalorder %v700_v8, 0  ;;  %vm895_vm1 = vcmp.lt.s32.totalorder %v700_v8, 0 }
 0x122   :  { %1348 = vrot.lane.b32.xlu1 %v1290_v45, %s1908_s16  ;;  %1350 = vrot.lane.b32.xlu0 %v1291_v16, %s1908_s16  ;;  %v1068_v30 = vsel %vm993_vm15, %v351_v6, 0.0  ;;  %v1069_v4 = vsel %vm994_vm7, %v353_v22, 0.0  ;;  %v945_v41 = vadd.s32 14, %v700_v8  ;;  %v427_v44 = vsel %vm404_vm12, %v424_v29, %v426_v62  ;;  %vm920_vm4 = vmand %vm895_vm1, %vm870_vm11 }
 0x123   :  { %vm1217_vm0 = vcmp.lt.s32.totalorder %v2845_v39, 13  ;;  %v429_v32 = vsel %vm404_vm12, %v426_v62, %v428_v56  ;;  %vm1218_vm10 = vcmp.lt.s32.totalorder %v968_v10, 13  ;;  %v355_v48 = vsel %vm3306_vm2, %v352_v27, %v354_v5 }
 0x124   :  { %v1292_v18 = vsel %vm1217_vm0, %v427_v44, 0.0  ;;  %v1293_v33 = vsel %vm1218_vm10, %v429_v32, 0.0  ;;  %v970_v34 = vsel %vm920_vm4, %v945_v41, %v700_v8  ;;  %v3307_v39 = vrot.slane %v2741_v13, 1 }
 0x125   :  { %vm995_vm3 = vcmp.gt.s32.totalorder %v970_v34, 0  ;;  %vm1220_vm14 = vcmp.lt.s32.totalorder %v970_v34, 13  ;;  %vm1219_vm5 = vcmp.lt.s32.totalorder %v969_v43, 13  ;;  %vm479_vm9 = vcmask 1042432  }
 0x126   :  { %1376 = vrot.lane.b32.xlu1 %v1304_v12, %s1908_s16  ;;  %1378 = vrot.lane.b32.xlu0 %v1305_v25, %s1908_s16  ;;  %v1070_v7 = vsel %vm995_vm3, %v355_v48, 0.0  ;;  %v431_v29 = vsel %vm404_vm12, %v428_v56, %v3307_v39  ;;  %v1295_v42 = vsel %vm1220_vm14, %v2777_v40, 0.0  ;;  %v480_v5 = vsel %vm479_vm9, %v452_v23, %v2630_v59 }
 0x127   :  { %v1294_v36 = vsel %vm1219_vm5, %v431_v29, 0.0  ;;  %vm1231_vm8 = vcmp.lt.s32.totalorder %v2883_v20, 13  ;;  %vm1642_vm12 = vcmask 257024   ;;  %vm1667_vm15 = vcmask 254976  }
 0x128   :  { %v1306_v49 = vsel %vm1231_vm8, %v480_v5, 0.0 }
 0x12a   :  { %1129 = vrot.lane.b32.xlu1 %v1068_v30, %s1907_s0  ;;  %1131 = vrot.lane.b32.xlu0 %v1069_v4, %s1907_s0 }
 0x12e   :  { %1352 = vrot.lane.b32.xlu1 %v1292_v18, %s1908_s16  ;;  %1354 = vrot.lane.b32.xlu0 %v1293_v33, %s1908_s16 }
 0x132   :  { %1135 = vrot.lane.b32.xlu0 %v2785_v3, %s1907_s0  ;;  %1133 = vrot.lane.b32.xlu1 %v1070_v7, %s1907_s0  ;;  %v1702_v3 = vld [vmem:[%s3222_s2] ss:$0 sm:$0xff] }
 0x136   :  { %1358 = vrot.lane.b32.xlu0 %v1295_v42, %s1908_s16  ;;  %1356 = vrot.lane.b32.xlu1 %v1294_v36, %s1908_s16 }
 0x13a   :  { %1438 = vrot.lane.b32.xlu0 %v1702_v3, %s1907_s0  ;;  %1380 = vrot.lane.b32.xlu1 %v1306_v49, %s1908_s16 }
 0x145   :  { %v1108_v9 = vpop.permute.xlu0 %1107 }
 0x149   :  { %v1138_v40 = vpop.permute.xlu1 %1137  ;;  %v1110_v47 = vpop.permute.xlu0 %1109 }
 0x14a   :  { %v1183_v45 = vadd.f32 %v1110_v47, %v2263_v51  ;;  %v1197_v15 = vadd.f32 %v1138_v40, %v2265_v52 }
 0x14d   :  { %v1333_v28 = vpop.permute.xlu1 %1332  ;;  %v1140_v21 = vpop.permute.xlu0 %1139 }
 0x151   :  { %v2973_v16 = vpop.permute.xlu1 %1360  ;;  %v1335_v23 = vpop.permute.xlu0 %1334 }
 0x152   :  { %3308 = vst [vmem:[#allocation8_spill] sm:$0xff] %v2973_v16  ;;  %v1408_v20 = vadd.f32 %v1335_v23, %v1183_v45 }
 0x155   :  { %v1363_v10 = vpop.permute.xlu0 %1362  ;;  %v1112_v43 = vpop.permute.xlu1 %1111 }
 0x156   :  { %v1422_v13 = vadd.f32 %v1363_v10, %v1197_v15 }
 0x159   :  { %v1114_v53 = vpop.permute.xlu1 %1113  ;;  %v1116_v27 = vpop.permute.xlu0 %1115 }
 0x15a   :  { %v1185_v61 = vadd.f32 %v1114_v53, %v2325_v24 }
 0x15d   :  { %v1142_v35 = vpop.permute.xlu1 %1141  ;;  %v1144_v55 = vpop.permute.xlu0 %1143 }
 0x15e   :  { %v1199_v24 = vadd.f32 %v1142_v35, %v2327_v26 }
 0x161   :  { %v1339_v8 = vpop.permute.xlu0 %1338  ;;  %v1337_v12 = vpop.permute.xlu1 %1336 }
 0x162   :  { %v1410_v52 = vadd.f32 %v1339_v8, %v1185_v61 }
 0x165   :  { %v1367_v25 = vpop.permute.xlu0 %1366  ;;  %v1365_v62 = vpop.permute.xlu1 %1364 }
 0x166   :  { %v1424_v53 = vadd.f32 %v1367_v25, %v1199_v24 }
 0x169   :  { %v2975_v56 = vpop.permute.xlu0 %1119  ;;  %v1118_v22 = vpop.permute.xlu1 %1117 }
 0x16a   :  { %v1187_v26 = vadd.f32 %v1118_v22, %v2402_v31 }
 0x16e   :  { %v2977_v6 = vpop.permute.xlu0 %1147  ;;  %v2979_v30 = vpop.permute.xlu1 %1145 }
 0x172   :  { %v1343_v51 = vpop.permute.xlu0 %1342  ;;  %v1341_v44 = vpop.permute.xlu1 %1340 }
 0x173   :  { %v1412_v25 = vadd.f32 %v1343_v51, %v1187_v26 }
 0x176   :  { %v1369_v18 = vpop.permute.xlu1 %1368 }
 0x177   :  { %v2981_v4 = vpop.permute.xlu0 %1370 }
 0x17b   :  { %v2983_v41 = vpop.permute.xlu0 %1123  ;;  %v2991_v48 = vpop.permute.xlu1 %1121 }
 0x180   :  { %v2985_v32 = vpop.permute.xlu0 %1151  ;;  %v2995_v39 = vpop.permute.xlu1 %1149 }
 0x184   :  { %v2987_v33 = vpop.permute.xlu0 %1346  ;;  %v1345_v36 = vpop.permute.xlu1 %1344 }
 0x188   :  { %v2989_v34 = vpop.permute.xlu0 %1374  ;;  %v3003_v3 = vpop.permute.xlu1 %1372 }
 0x18c   :  { %v2993_v7 = vpop.permute.xlu0 %1127  ;;  %v3009_v45 = vpop.permute.xlu1 %1125 }
 0x190   :  { %v2997_v29 = vpop.permute.xlu0 %1155  ;;  %v3013_v16 = vpop.permute.xlu1 %1153 }
 0x191   :  { %3309 = vst [vmem:[#allocation9_spill] sm:$0xff] %v2997_v29  ;;  %3314 = vst [vmem:[#allocation14_spill] sm:$0xff] %v3013_v16  ;;  %v1182_v29 = vadd.f32 %v1108_v9, %v2211_v17 }
 0x193   :  { %v1407_v19 = vadd.f32 %v1333_v28, %v1182_v29 }
 0x194   :  { %v2999_v42 = vpop.permute.xlu0 %1350 }
 0x198   :  { %v3001_v5 = vpop.permute.xlu0 %1378 }
 0x199   :  { %3310 = vst [vmem:[#allocation10_spill] sm:$0xff] %v3001_v5  ;;  %v1184_v5 = vadd.f32 %v1112_v43, %v2294_v50 }
 0x19c   :  { %v3005_v49 = vpop.permute.xlu0 %1131 }
 0x19d   :  { %3311 = vst [vmem:[#allocation11_spill] sm:$0xff] %v3005_v49  ;;  %v1198_v49 = vadd.f32 %v1140_v21, %v2296_v0  ;;  %v1186_v0 = vadd.f32 %v1116_v27, %v2364_v1  ;;  %v1200_v1 = vadd.f32 %v1144_v55, %v2366_v2  ;;  %v1201_v2 = vadd.f32 %v2979_v30, %v2404_v37 }
 0x19e   :  { %v1189_v37 = vadd.f32 %v2991_v48, %v2503_v57  ;;  %v1203_v57 = vadd.f32 %v2995_v39, %v2509_v63  ;;  %v1191_v63 = vadd.f32 %v3009_v45, %v2580_v11  ;;  %v3316_v11 = vld [vmem:[#allocation5_spill] sm:$0xff] }
 0x19f   :  { %v1423_v9 = vadd.f32 %v1365_v62, %v1198_v49  ;;  %v1425_v62 = vadd.f32 %v1369_v18, %v1200_v1  ;;  %v1426_v18 = vadd.f32 %v2981_v4, %v1201_v2 }
 0x1a0   :  { %v3007_v47 = vpop.permute.xlu0 %1354  ;;  %v1414_v4 = vadd.f32 %v2987_v33, %v1189_v37 }
 0x1a1   :  { %3312 = vst [vmem:[#allocation12_spill] sm:$0xff] %v3007_v47  ;;  %v1409_v47 = vadd.f32 %v1337_v12, %v1184_v5 }
 0x1a4   :  { %v3011_v23 = vpop.permute.xlu0 %1135 }
 0x1a5   :  { %3313 = vst [vmem:[#allocation13_spill] sm:$0xff] %v3011_v23  ;;  %v3024_v23 = vpop.permute.xlu1 %1348 }
 0x1a8   :  { %v3015_v59 = vpop.permute.xlu0 %1358 }
 0x1a9   :  { %3315 = vst [vmem:[#allocation15_spill] sm:$0xff] %v3015_v59  ;;  %v3034_v61 = vpop.permute.xlu1 %1376 }
 0x1ac   :  { %v3022_v60 = vpop.permute.xlu0 %1438 }
 0x1ad   :  { %v1442_v16 = vadd.f32 %v3022_v60, %v1408_v20  ;;  %v1441_v59 = vadd.f32 %v3022_v60, %v1407_v19  ;;  %v1456_v17 = vadd.f32 %v3022_v60, %v1422_v13  ;;  %v1443_v50 = vadd.f32 %v3022_v60, %v1409_v47  ;;  %v1130_v22 = vpop.permute.xlu1 %1129 }
 0x1ae   :  { %v1444_v28 = vadd.f32 %v3022_v60, %v1410_v52  ;;  %v1457_v21 = vadd.f32 %v3022_v60, %v1423_v9  ;;  %v1411_v13 = vadd.f32 %v1341_v44, %v1186_v0  ;;  %v1188_v44 = vadd.f32 %v2975_v56, %v2464_v46 }
 0x1af   :  { %v1467_v15 = vmax.f32 %v1442_v16, 0.0  ;;  %v1466_v40 = vmax.f32 %v1441_v59, 0.0  ;;  %v1481_v43 = vmax.f32 %v1456_v17, 0.0  ;;  %v1468_v19 = vmax.f32 %v1443_v50, 0.0 }
 0x1b0   :  { %v1469_v59 = vmax.f32 %v1444_v28, 0.0  ;;  %v1458_v16 = vadd.f32 %v3022_v60, %v1424_v53  ;;  %v1482_v8 = vmax.f32 %v1457_v21, 0.0  ;;  %v1445_v12 = vadd.f32 %v3022_v60, %v1411_v13 }
 0x1b1   :  { %v1729_v10 = vpack.c.bf16 %v1467_v15, %v1467_v15  ;;  %v1728_v20 = vpack.c.bf16 %v1466_v40, %v1466_v40  ;;  %v1743_v27 = vpack.c.bf16 %v1481_v43, %v1481_v43  ;;  %v1730_v35 = vpack.c.bf16 %v1468_v19, %v1468_v19  ;;  %v1353_v15 = vpop.permute.xlu1 %1352 }
 0x1b2   :  { %v1731_v31 = vpack.c.bf16 %v1469_v59, %v1469_v59  ;;  %v1483_v55 = vmax.f32 %v1458_v16, 0.0  ;;  %v1744_v29 = vpack.c.bf16 %v1482_v8, %v1482_v8  ;;  %v1470_v5 = vmax.f32 %v1445_v12, 0.0  ;;  %v3320_v8 = vld [vmem:[#allocation7_spill] sm:$0xff] }
 0x1b3   :  { %1569 = vrot.lane.b32.xlu0 %v1729_v10, %s1908_s16  ;;  %1567 = vrot.lane.b32.xlu1 %v1728_v20, %s1908_s16  ;;  %v1446_v49 = vadd.f32 %v3022_v60, %v1412_v25  ;;  %v1459_v51 = vadd.f32 %v3022_v60, %v1425_v62  ;;  %v1413_v47 = vadd.f32 %v1345_v36, %v1188_v44 }
 0x1b4   :  { %v1202_v46 = vadd.f32 %v2977_v6, %v2466_v14  ;;  %v1745_v56 = vpack.c.bf16 %v1483_v55, %v1483_v55  ;;  %v1460_v30 = vadd.f32 %v3022_v60, %v1426_v18  ;;  %v1732_v17 = vpack.c.bf16 %v1470_v5, %v1470_v5 }
 0x1b5   :  { %v1471_v52 = vmax.f32 %v1446_v49, 0.0  ;;  %v1484_v9 = vmax.f32 %v1459_v51, 0.0  ;;  %v1447_v50 = vadd.f32 %v3022_v60, %v1413_v47  ;;  %v1190_v14 = vadd.f32 %v2983_v41, %v2540_v58  ;;  %v1134_v21 = vpop.permute.xlu1 %1133  ;;  %v3322_v49 = vld [vmem:[#allocation2_spill] sm:$0xff]  ;;  %v3323_v51 = vld [vmem:[#allocation13_spill] sm:$0xff]  ;;  %v3324_v47 = vld [vmem:[#allocation3_spill] sm:$0xff] }
 0x1b6   :  { %v1427_v36 = vadd.f32 %v3003_v3, %v1202_v46  ;;  %v1448_v6 = vadd.f32 %v3022_v60, %v1414_v4  ;;  %v1485_v33 = vmax.f32 %v1460_v30, 0.0  ;;  %v1428_v3 = vadd.f32 %v2989_v34, %v1203_v57  ;;  %v3325_v46 = vld [vmem:[#allocation14_spill] sm:$0xff] }
 0x1b7   :  { %1597 = vrot.lane.b32.xlu0 %v1743_v27, %s1908_s16  ;;  %1571 = vrot.lane.b32.xlu1 %v1730_v35, %s1908_s16  ;;  %v1733_v40 = vpack.c.bf16 %v1471_v52, %v1471_v52  ;;  %v1746_v0 = vpack.c.bf16 %v1484_v9, %v1484_v9  ;;  %v1472_v24 = vmax.f32 %v1447_v50, 0.0  ;;  %v1415_v28 = vadd.f32 %v3024_v23, %v1190_v14  ;;  %v3318_v35 = vld [vmem:[#allocation6_spill] sm:$0xff] }
 0x1b8   :  { %v1461_v48 = vadd.f32 %v3022_v60, %v1427_v36  ;;  %v1204_v58 = vadd.f32 %v2985_v32, %v2546_v38  ;;  %v1473_v41 = vmax.f32 %v1448_v6, 0.0  ;;  %v1462_v39 = vadd.f32 %v3022_v60, %v1428_v3  ;;  %v3326_v36 = vld [vmem:[#allocation4_spill] sm:$0xff]  ;;  %v3328_v57 = vld [vmem:[#allocation10_spill] sm:$0xff] }
 0x1b9   :  { %v1747_v10 = vpack.c.bf16 %v1485_v33, %v1485_v33  ;;  %v1734_v20 = vpack.c.bf16 %v1472_v24, %v1472_v24  ;;  %v1449_v34 = vadd.f32 %v3022_v60, %v1415_v28  ;;  %v1416_v23 = vadd.f32 %v2999_v42, %v1191_v63  ;;  %v3317_v42 = vld [vmem:[#allocation12_spill] sm:$0xff]  ;;  %v1357_v27 = vpop.permute.xlu1 %1356 }
 0x1ba   :  { %v1486_v43 = vmax.f32 %v1461_v48, 0.0  ;;  %v1429_v19 = vadd.f32 %v3034_v61, %v1204_v58  ;;  %v1192_v38 = vadd.f32 %v2993_v7, %v2624_v54  ;;  %v1193_v32 = vadd.f32 %v1130_v22, %v3316_v11  ;;  %v3319_v54 = vld [vmem:[#allocation11_spill] sm:$0xff]  ;;  %v3329_v48 = vld [vmem:[#allocation8_spill] sm:$0xff] }
 0x1bb   :  { %1573 = vrot.lane.b32.xlu0 %v1731_v31, %s1908_s16  ;;  %1599 = vrot.lane.b32.xlu1 %v1744_v29, %s1908_s16  ;;  %v1735_v45 = vpack.c.bf16 %v1473_v41, %v1473_v41  ;;  %v1487_v53 = vmax.f32 %v1462_v39, 0.0  ;;  %v1474_v1 = vmax.f32 %v1449_v34, 0.0  ;;  %v1450_v26 = vadd.f32 %v3022_v60, %v1416_v23  ;;  %v3321_v22 = vld [vmem:[#allocation15_spill] sm:$0xff] }
 0x1bc   :  { %v1748_v13 = vpack.c.bf16 %v1486_v43, %v1486_v43  ;;  %v1463_v59 = vadd.f32 %v3022_v60, %v1429_v19  ;;  %v1418_v16 = vadd.f32 %v3317_v42, %v1193_v32  ;;  %v1417_v61 = vadd.f32 %v1353_v15, %v1192_v38  ;;  %v3327_v15 = vld [vmem:[#allocation9_spill] sm:$0xff] }
 0x1bd   :  { %v1194_v7 = vadd.f32 %v3319_v54, %v3318_v35  ;;  %v1195_v12 = vadd.f32 %v1134_v21, %v3320_v8  ;;  %v1749_v25 = vpack.c.bf16 %v1487_v53, %v1487_v53  ;;  %v1736_v44 = vpack.c.bf16 %v1474_v1, %v1474_v1 }
 0x1be   :  { %v1452_v62 = vadd.f32 %v3022_v60, %v1418_v16  ;;  %v1475_v2 = vmax.f32 %v1450_v26, 0.0  ;;  %v1488_v31 = vmax.f32 %v1463_v59, 0.0  ;;  %v1451_v55 = vadd.f32 %v3022_v60, %v1417_v61 }
 0x1bf   :  { %1601 = vrot.lane.b32.xlu0 %v1745_v56, %s1908_s16  ;;  %1575 = vrot.lane.b32.xlu1 %v1732_v17, %s1908_s16  ;;  %v1420_v29 = vadd.f32 %v3321_v22, %v1195_v12  ;;  %v1419_v5 = vadd.f32 %v1357_v27, %v1194_v7  ;;  %v1196_v18 = vadd.f32 %v3323_v51, %v3322_v49  ;;  %v1381_v17 = vpop.permute.xlu1 %1380 }
 0x1c0   :  { %v1205_v37 = vadd.f32 %v3325_v46, %v3324_v47  ;;  %v1737_v52 = vpack.c.bf16 %v1475_v2, %v1475_v2  ;;  %v1750_v9 = vpack.c.bf16 %v1488_v31, %v1488_v31  ;;  %v1477_v50 = vmax.f32 %v1452_v62, 0.0 }
 0x1c1   :  { %v1454_v56 = vadd.f32 %v3022_v60, %v1420_v29  ;;  %v1453_v30 = vadd.f32 %v3022_v60, %v1419_v5  ;;  %v1476_v4 = vmax.f32 %v1451_v55, 0.0  ;;  %v1206_v14 = vadd.f32 %v3327_v15, %v3326_v36 }
 0x1c2   :  { %v1430_v6 = vadd.f32 %v3328_v57, %v1205_v37  ;;  %v1739_v3 = vpack.c.bf16 %v1477_v50, %v1477_v50 }
 0x1c3   :  { %1577 = vrot.lane.b32.xlu0 %v1733_v40, %s1908_s16  ;;  %1603 = vrot.lane.b32.xlu1 %v1746_v0, %s1908_s16  ;;  %v1421_v40 = vadd.f32 %v3329_v48, %v1196_v18  ;;  %v1431_v0 = vadd.f32 %v1381_v17, %v1206_v14  ;;  %v1479_v33 = vmax.f32 %v1454_v56, 0.0  ;;  %v1738_v28 = vpack.c.bf16 %v1476_v4, %v1476_v4 }
 0x1c4   :  { %v1464_v24 = vadd.f32 %v3022_v60, %v1430_v6  ;;  %v1478_v58 = vmax.f32 %v1453_v30, 0.0 }
 0x1c5   :  { %v1455_v63 = vadd.f32 %v3022_v60, %v1421_v40  ;;  %v1465_v41 = vadd.f32 %v3022_v60, %v1431_v0  ;;  %v1741_v39 = vpack.c.bf16 %v1479_v33, %v1479_v33 }
 0x1c6   :  { %v1740_v21 = vpack.c.bf16 %v1478_v58, %v1478_v58 }
 0x1c7   :  { %1605 = vrot.lane.b32.xlu0 %v1747_v10, %s1908_s16  ;;  %1579 = vrot.lane.b32.xlu1 %v1734_v20, %s1908_s16  ;;  %v1489_v10 = vmax.f32 %v1464_v24, 0.0  ;;  %v1480_v20 = vmax.f32 %v1455_v63, 0.0  ;;  %v1490_v43 = vmax.f32 %v1465_v41, 0.0 }
 0x1c9   :  { %v1751_v34 = vpack.c.bf16 %v1489_v10, %v1489_v10  ;;  %v1742_v23 = vpack.c.bf16 %v1480_v20, %v1480_v20  ;;  %v1752_v19 = vpack.c.bf16 %v1490_v43, %v1490_v43 }
 0x1cb   :  { %1581 = vrot.lane.b32.xlu0 %v1735_v45, %s1908_s16  ;;  %1607 = vrot.lane.b32.xlu1 %v1748_v13, %s1908_s16 }
 0x1cf   :  { %1609 = vrot.lane.b32.xlu0 %v1749_v25, %s1908_s16  ;;  %1583 = vrot.lane.b32.xlu1 %v1736_v44, %s1908_s16 }
 0x1d3   :  { %1585 = vrot.lane.b32.xlu0 %v1737_v52, %s1908_s16  ;;  %1611 = vrot.lane.b32.xlu1 %v1750_v9, %s1908_s16 }
 0x1d7   :  { %1589 = vrot.lane.b32.xlu0 %v1739_v3, %s1908_s16  ;;  %1587 = vrot.lane.b32.xlu1 %v1738_v28, %s1908_s16 }
 0x1db   :  { %1593 = vrot.lane.b32.xlu0 %v1741_v39, %s1908_s16  ;;  %1591 = vrot.lane.b32.xlu1 %v1740_v21, %s1908_s16 }
 0x1df   :  { %1613 = vrot.lane.b32.xlu0 %v1751_v34, %s1908_s16  ;;  %1595 = vrot.lane.b32.xlu1 %v1742_v23, %s1908_s16 }
 0x1e3   :  { %1615 = vrot.lane.b32.xlu1 %v1752_v19, %s1908_s16 }
 0x225   :  { %v1570_v60 = vpop.permute.xlu0 %1569  ;;  %v1568_v38 = vpop.permute.xlu1 %1567 }
 0x226   :  { %1644 = vst.msk [vmem:[%s3223_s3 + $0x4] sm:$0xf] %vm1642_vm12, %v1570_v60  ;;  %1643 = vst.msk [vmem:[%s3223_s3] sm:$0xf] %vm1642_vm12, %v1568_v38 }
 0x229   :  { %v1598_v11 = vpop.permute.xlu0 %1597  ;;  %v1572_v32 = vpop.permute.xlu1 %1571 }
 0x22a   :  { %1658 = vst.msk [vmem:[%s3223_s3 + $0x3c] sm:$0xf] %vm1642_vm12, %v1598_v11  ;;  %1645 = vst.msk [vmem:[%s3223_s3 + $0x8] sm:$0xf] %vm1642_vm12, %v1572_v32 }
 0x22d   :  { %v1574_v45 = vpop.permute.xlu0 %1573  ;;  %v1600_v53 = vpop.permute.xlu1 %1599 }
 0x22e   :  { %1646 = vst.msk [vmem:[%s3223_s3 + $0xc] sm:$0xf] %vm1642_vm12, %v1574_v45  ;;  %1659 = vst.msk [vmem:[%s3223_s3 + $0x40] sm:$0xf] %vm1642_vm12, %v1600_v53 }
 0x231   :  { %v1602_v13 = vpop.permute.xlu0 %1601  ;;  %v1576_v1 = vpop.permute.xlu1 %1575 }
 0x232   :  { %1660 = vst.msk [vmem:[%s3223_s3 + $0x44] sm:$0xf] %vm1642_vm12, %v1602_v13  ;;  %1647 = vst.msk [vmem:[%s3223_s3 + $0x10] sm:$0xf] %vm1642_vm12, %v1576_v1 }
 0x235   :  { %v1578_v26 = vpop.permute.xlu0 %1577  ;;  %v1604_v59 = vpop.permute.xlu1 %1603 }
 0x236   :  { %1648 = vst.msk [vmem:[%s3223_s3 + $0x14] sm:$0xf] %vm1642_vm12, %v1578_v26  ;;  %1661 = vst.msk [vmem:[%s3223_s3 + $0x48] sm:$0xf] %vm1642_vm12, %v1604_v59 }
 0x239   :  { %v1606_v42 = vpop.permute.xlu0 %1605  ;;  %v1580_v16 = vpop.permute.xlu1 %1579 }
 0x23a   :  { %1662 = vst.msk [vmem:[%s3223_s3 + $0x4c] sm:$0xf] %vm1642_vm12, %v1606_v42  ;;  %1649 = vst.msk [vmem:[%s3223_s3 + $0x18] sm:$0xf] %vm1642_vm12, %v1580_v16 }
 0x23d   :  { %v1582_v61 = vpop.permute.xlu0 %1581  ;;  %v1608_v27 = vpop.permute.xlu1 %1607 }
 0x23e   :  { %1650 = vst.msk [vmem:[%s3223_s3 + $0x1c] sm:$0xf] %vm1642_vm12, %v1582_v61  ;;  %1663 = vst.msk [vmem:[%s3223_s3 + $0x50] sm:$0xf] %vm1642_vm12, %v1608_v27 }
 0x241   :  { %v1610_v35 = vpop.permute.xlu0 %1609  ;;  %v1584_v54 = vpop.permute.xlu1 %1583 }
 0x242   :  { %1664 = vst.msk [vmem:[%s3223_s3 + $0x54] sm:$0xf] %vm1642_vm12, %v1610_v35  ;;  %1651 = vst.msk [vmem:[%s3223_s3 + $0x20] sm:$0xf] %vm1642_vm12, %v1584_v54 }
 0x245   :  { %v1586_v7 = vpop.permute.xlu0 %1585  ;;  %v1612_v8 = vpop.permute.xlu1 %1611 }
 0x246   :  { %1652 = vst.msk [vmem:[%s3223_s3 + $0x24] sm:$0xf] %vm1642_vm12, %v1586_v7  ;;  %1665 = vst.msk [vmem:[%s3223_s3 + $0x58] sm:$0xf] %vm1642_vm12, %v1612_v8 }
 0x249   :  { %v1590_v12 = vpop.permute.xlu0 %1589  ;;  %v1588_v25 = vpop.permute.xlu1 %1587 }
 0x24a   :  { %1654 = vst.msk [vmem:[%s3223_s3 + $0x2c] sm:$0xf] %vm1642_vm12, %v1590_v12  ;;  %1653 = vst.msk [vmem:[%s3223_s3 + $0x28] sm:$0xf] %vm1642_vm12, %v1588_v25 }
 0x24d   :  { %v1594_v62 = vpop.permute.xlu0 %1593  ;;  %v1592_v44 = vpop.permute.xlu1 %1591 }
 0x24e   :  { %1656 = vst.msk [vmem:[%s3223_s3 + $0x34] sm:$0xf] %vm1642_vm12, %v1594_v62  ;;  %1655 = vst.msk [vmem:[%s3223_s3 + $0x30] sm:$0xf] %vm1642_vm12, %v1592_v44 }
 0x251   :  { %v1614_v2 = vpop.permute.xlu0 %1613  ;;  %v1596_v31 = vpop.permute.xlu1 %1595 }
 0x252   :  { %1666 = vst.msk [vmem:[%s3223_s3 + $0x5c] sm:$0xf] %vm1642_vm12, %v1614_v2  ;;  %1657 = vst.msk [vmem:[%s3223_s3 + $0x38] sm:$0xf] %vm1642_vm12, %v1596_v31 }
 0x255   :  { %v1616_v55 = vpop.permute.xlu1 %1615 }
 0x256   :  { %1668 = vst.msk [vmem:[%s3223_s3 + $0x60] sm:$0x3] %vm1667_vm15, %v1616_v55 }

</bundles_post_ra>
